<compile_context>
chip_gen: v5e
topology: v5e:2x2
jax: 0.10.0
libtpu: 0.0.40
codegen_flags: <defaults>
</compile_context>

<pallas_src>
import functools

import jax
import jax.numpy as jnp
from jax.experimental import pallas as pl
from jax.experimental.pallas import tpu as pltpu


def _round_up(n, m):
    return ((n + m - 1) // m) * m


def _vae_kernel(x_ref, eps_ref,
                w1_ref, b1_ref,
                wml_ref, bml_ref,
                w2_ref, b2_ref,
                w3_ref, b3_ref,
                recon_ref, mulv_ref,
                *, compute_dtype, latent_pad):
    x = x_ref[...]

    # encode: h = relu(x @ W1 + b1)   (MXU in compute_dtype, f32 accumulate, f32 VPU)
    h = jnp.dot(x, w1_ref[...], preferred_element_type=jnp.float32) + b1_ref[...]
    h = jnp.maximum(h, 0.0)

    # fused mu/logvar head: one matmul, one lane-dense (tb, 2*Lp) output
    mulv = (jnp.dot(h.astype(compute_dtype), wml_ref[...],
                    preferred_element_type=jnp.float32) + bml_ref[...])
    mu = mulv[:, :latent_pad]
    logvar = mulv[:, latent_pad:]

    # reparameterize: z = mu + eps * exp(0.5 * logvar)   (f32 EUP/VPU -> safe on v5e)
    std = jnp.exp(0.5 * logvar)
    z = mu + eps_ref[...] * std

    # decode: h2 = relu(z @ W2 + b2); recon = sigmoid(h2 @ W3 + b3)
    h2 = jnp.dot(z.astype(compute_dtype), w2_ref[...],
                 preferred_element_type=jnp.float32) + b2_ref[...]
    h2 = jnp.maximum(h2, 0.0)
    logits = jnp.dot(h2.astype(compute_dtype), w3_ref[...],
                     preferred_element_type=jnp.float32) + b3_ref[...]

    # recon stored in recon_ref.dtype (bf16 by default) -> less HBM writeback
    recon_ref[...] = jax.nn.sigmoid(logits).astype(recon_ref.dtype)
    mulv_ref[...] = mulv


def vae_forward(x, eps, params, *, tile_b=512,
                compute_dtype=jnp.bfloat16, recon_dtype=None):
    """Pallas VAE forward. x: (B, input_dim), eps: (B, latent_dim) ~ N(0, 1).

    Returns (recon, mu, logvar). mu/logvar are float32; recon is `recon_dtype`
    (defaults to `compute_dtype`, i.e. bf16 on the fast path, f32 on the exact path).
    bf16 only feeds MXU operands; accumulation and all elementwise math stay f32.
    """
    if recon_dtype is None:
        recon_dtype = compute_dtype

    B, input_dim = x.shape
    latent_dim = eps.shape[1]
    hidden_dim = params["w1"].shape[1]

    # lane-dense padded feature dims (multiples of 128)
    Ip = _round_up(input_dim, 128)
    Hp = _round_up(hidden_dim, 128)
    Lp = _round_up(latent_dim, 128)

    # batch tiling:
    #   * sublane multiple 16 for bf16 operands (native (16,128) packing), else 8
    #   * cap tile at tile_b, balance tiles, and prefer >= 2 grid steps when the batch
    #     allows it so ("parallel",) can shard across v7x's two TensorCores.
    mult = 16 if jnp.dtype(compute_dtype) == jnp.dtype(jnp.bfloat16) else 8
    Bmin = _round_up(B, mult)
    n_steps = max(1, -(-Bmin // min(tile_b, Bmin)))          # ceil-div
    if n_steps == 1 and Bmin // mult >= 2:
        n_steps = 2                                          # keep both v7x TCs busy
    tb = _round_up(-(-Bmin // n_steps), mult)
    Bp = tb * n_steps
    grid = (n_steps,)

    def pad2(a, rows, cols):
        return jnp.pad(a, ((0, rows - a.shape[0]), (0, cols - a.shape[1])))

    # pad weights with zero rows/cols (exact on original coords); fuse mu/logvar head
    w1 = pad2(params["w1"], Ip, Hp).astype(compute_dtype)
    b1 = pad2(params["b1"], 1, Hp).astype(jnp.float32)
    wml = jnp.concatenate([pad2(params["wmu"], Hp, Lp),
                           pad2(params["wlv"], Hp, Lp)], axis=1).astype(compute_dtype)
    bml = jnp.concatenate([pad2(params["bmu"], 1, Lp),
                           pad2(params["blv"], 1, Lp)], axis=1).astype(jnp.float32)
    w2 = pad2(params["w2"], Lp, Hp).astype(compute_dtype)
    b2 = pad2(params["b2"], 1, Hp).astype(jnp.float32)
    w3 = pad2(params["w3"], Hp, Ip).astype(compute_dtype)
    b3 = pad2(params["b3"], 1, Ip).astype(jnp.float32)

    xp = pad2(x, Bp, Ip).astype(compute_dtype)
    epsp = pad2(eps, Bp, Lp).astype(jnp.float32)

    # scoped-VMEM budget from the actual resident buffers (weights single-buffered,
    # activation tiles double-buffered, plus intermediates), with 2x headroom.
    cbytes = jnp.dtype(compute_dtype).itemsize
    rbytes = jnp.dtype(recon_dtype).itemsize
    weight_bytes = sum(int(a.size) * a.dtype.itemsize
                       for a in (w1, b1, wml, bml, w2, b2, w3, b3))
    io_bytes = 2 * (tb * Ip * cbytes + tb * Lp * 4            # x, eps tiles
                    + tb * Ip * rbytes + tb * 2 * Lp * 4)     # recon, mu||logvar tiles
    scratch_bytes = tb * Hp * 4 * 2 + tb * 2 * Lp * 4 + tb * Ip * 4
    est = 2 * weight_bytes + io_bytes + scratch_bytes
    vmem_limit = int(min(64 << 20, max(2 * est, 16 << 20)))

    kernel = functools.partial(_vae_kernel,
                               compute_dtype=compute_dtype,
                               latent_pad=Lp)

    def run(single_buffer_weights):
        def const_spec(shape):
            # grid-invariant weights: nothing to prefetch, so single-buffer to halve
            # their VMEM residency (important on v7x's 64 MiB VMEM).
            if single_buffer_weights:
                return pl.BlockSpec(shape, lambda i: (0, 0),
                                    pipeline_mode=pl.Buffered(1))
            return pl.BlockSpec(shape, lambda i: (0, 0))

        in_specs = [
            pl.BlockSpec((tb, Ip), lambda i: (i, 0)),   # x
            pl.BlockSpec((tb, Lp), lambda i: (i, 0)),   # eps
            const_spec(w1.shape), const_spec(b1.shape),
            const_spec(wml.shape), const_spec(bml.shape),
            const_spec(w2.shape), const_spec(b2.shape),
            const_spec(w3.shape), const_spec(b3.shape),
        ]
        out_specs = [
            pl.BlockSpec((tb, Ip), lambda i: (i, 0)),       # recon (lane-dense)
            pl.BlockSpec((tb, 2 * Lp), lambda i: (i, 0)),   # fused mu||logvar
        ]
        out_shape = (
            jax.ShapeDtypeStruct((Bp, Ip), recon_dtype),
            jax.ShapeDtypeStruct((Bp, 2 * Lp), jnp.float32),
        )
        return pl.pallas_call(
            kernel,
            out_shape=out_shape,
            grid_spec=pltpu.PrefetchScalarGridSpec(
                num_scalar_prefetch=0,
                grid=grid,
                in_specs=in_specs,
                out_specs=out_specs,
            ),
            compiler_params=pltpu.CompilerParams(
                dimension_semantics=("parallel",),
                vmem_limit_bytes=vmem_limit),
        )(xp, epsp, w1, b1, wml, bml, w2, b2, w3, b3)

    try:
        recon_p, mulv_p = run(single_buffer_weights=True)
    except Exception:
        # pl.Buffered(1) not supported by this JAX build -> default double-buffering
        recon_p, mulv_p = run(single_buffer_weights=False)

    recon = recon_p[:B, :input_dim]
    mu = mulv_p[:B, :latent_dim]
    logvar = mulv_p[:B, Lp:Lp + latent_dim]
    return recon, mu, logvar


def init_params(key, input_dim, hidden_dim, latent_dim):
    """PyTorch-style uniform(-1/sqrt(fan_in), 1/sqrt(fan_in)) init.
    Weights stored as (in_features, out_features) so y = x @ W + b."""
    def linear(k, fan_in, fan_out):
        kw, kb = jax.random.split(k)
        bound = 1.0 / jnp.sqrt(fan_in)
        w = jax.random.uniform(kw, (fan_in, fan_out), jnp.float32, -bound, bound)
        b = jax.random.uniform(kb, (1, fan_out), jnp.float32, -bound, bound)
        return w, b

    k1, k2, k3, k4, k5 = jax.random.split(key, 5)
    w1, b1 = linear(k1, input_dim, hidden_dim)
    wmu, bmu = linear(k2, hidden_dim, latent_dim)
    wlv, blv = linear(k3, hidden_dim, latent_dim)
    w2, b2 = linear(k4, latent_dim, hidden_dim)
    w3, b3 = linear(k5, hidden_dim, input_dim)
    return dict(w1=w1, b1=b1, wmu=wmu, bmu=bmu, wlv=wlv, blv=blv,
                w2=w2, b2=b2, w3=w3, b3=b3)


def vae_reference(x, eps, p):
    """Pure-JAX reference matching PyTorch semantics."""
    h = jax.nn.relu(x @ p["w1"] + p["b1"])
    mu = h @ p["wmu"] + p["bmu"]
    logvar = h @ p["wlv"] + p["blv"]
    z = mu + eps * jnp.exp(0.5 * logvar)
    h2 = jax.nn.relu(z @ p["w2"] + p["b2"])
    recon = jax.nn.sigmoid(h2 @ p["w3"] + p["b3"])
    return recon, mu, logvar


if __name__ == "__main__":
    input_dim, hidden_dim, latent_dim = 64, 32, 16
    batch = 16

    key = jax.random.PRNGKey(0)
    kx, keps, kparam = jax.random.split(key, 3)

    x = jax.random.uniform(kx, (batch, input_dim), jnp.float32)      # "image" vectors in [0,1)
    eps = jax.random.normal(keps, (batch, latent_dim), jnp.float32)  # torch.randn_like(std)
    params = init_params(kparam, input_dim, hidden_dim, latent_dim)

    r_ref, mu_ref, lv_ref = vae_reference(x, eps, params)

    # exact f32 path (also exercises a 2-step batch grid at this size)
    recon, mu, logvar = vae_forward(x, eps, params, compute_dtype=jnp.float32)
    jax.block_until_ready((recon, mu, logvar))
    assert jnp.allclose(recon, r_ref, atol=1e-5), "recon mismatch"
    assert jnp.allclose(mu, mu_ref, atol=1e-5), "mu mismatch"
    assert jnp.allclose(logvar, lv_ref, atol=1e-5), "logvar mismatch"

    # default fast path: bf16 MXU operands + bf16 recon (f32 accumulate / elementwise)
    recon_bf, mu_bf, lv_bf = vae_forward(x, eps, params)
    jax.block_until_ready((recon_bf, mu_bf, lv_bf))
    assert jnp.allclose(recon_bf.astype(jnp.float32), r_ref, atol=3e-2), "bf16 recon mismatch"
    assert jnp.allclose(mu_bf, mu_ref, atol=5e-2), "bf16 mu mismatch"

    print("KERNEL_OK")
</pallas_src>

<mosaic_0001>
module attributes {stable_mosaic.version = 11 : i64} {
  func.func @_vae_kernel(%arg0: i32, %arg1: memref<8x128xf32, #tpu.memory_space<vmem>>, %arg2: memref<8x128xf32, #tpu.memory_space<vmem>>, %arg3: memref<128x128xf32, #tpu.memory_space<vmem>>, %arg4: memref<1x128xf32, #tpu.memory_space<vmem>>, %arg5: memref<128x256xf32, #tpu.memory_space<vmem>>, %arg6: memref<1x256xf32, #tpu.memory_space<vmem>>, %arg7: memref<128x128xf32, #tpu.memory_space<vmem>>, %arg8: memref<1x128xf32, #tpu.memory_space<vmem>>, %arg9: memref<128x128xf32, #tpu.memory_space<vmem>>, %arg10: memref<1x128xf32, #tpu.memory_space<vmem>>, %arg11: memref<8x128xf32, #tpu.memory_space<vmem>>, %arg12: memref<8x256xf32, #tpu.memory_space<vmem>>) attributes {dimension_semantics = [#tpu.dimension_semantics<parallel>], iteration_bounds = array<i64: 2>, scalar_prefetch = 0 : i64, scratch_operands = 0 : i64, tpu.core_type = #tpu.core_type<tc>, window_params = [{transform_indices = @transform_0, window_bounds = array<i64: 8, 128>}, {transform_indices = @transform_1, window_bounds = array<i64: 8, 128>}, {pipeline_mode = #tpu.pipeline_mode<synchronous>, transform_indices = @transform_2, window_bounds = array<i64: 128, 128>}, {pipeline_mode = #tpu.pipeline_mode<synchronous>, transform_indices = @transform_3, window_bounds = array<i64: 1, 128>}, {pipeline_mode = #tpu.pipeline_mode<synchronous>, transform_indices = @transform_4, window_bounds = array<i64: 128, 256>}, {pipeline_mode = #tpu.pipeline_mode<synchronous>, transform_indices = @transform_5, window_bounds = array<i64: 1, 256>}, {pipeline_mode = #tpu.pipeline_mode<synchronous>, transform_indices = @transform_6, window_bounds = array<i64: 128, 128>}, {pipeline_mode = #tpu.pipeline_mode<synchronous>, transform_indices = @transform_7, window_bounds = array<i64: 1, 128>}, {pipeline_mode = #tpu.pipeline_mode<synchronous>, transform_indices = @transform_8, window_bounds = array<i64: 128, 128>}, {pipeline_mode = #tpu.pipeline_mode<synchronous>, transform_indices = @transform_9, window_bounds = array<i64: 1, 128>}, {transform_indices = @transform_10, window_bounds = array<i64: 8, 128>}, {transform_indices = @transform_11, window_bounds = array<i64: 8, 256>}]} {
    %c0 = arith.constant 0 : index
    %c0_0 = arith.constant 0 : index
    %0 = vector.load %arg1[%c0, %c0_0] : memref<8x128xf32, #tpu.memory_space<vmem>>, vector<8x128xf32>
    %c0_1 = arith.constant 0 : index
    %c0_2 = arith.constant 0 : index
    %1 = vector.load %arg3[%c0_1, %c0_2] : memref<128x128xf32, #tpu.memory_space<vmem>>, vector<128x128xf32>
    %cst = arith.constant dense<0.000000e+00> : vector<8x128xf32>
    %2 = tpu.matmul %0, %1, %cst {dimension_numbers = #tpu.dot_dimension_numbers<[1], [0], [0], [1], [0, 0, 1, 1], [], []>} : vector<8x128xf32>, vector<128x128xf32>, vector<8x128xf32> -> vector<8x128xf32>
    %c0_3 = arith.constant 0 : index
    %c0_4 = arith.constant 0 : index
    %3 = vector.load %arg4[%c0_3, %c0_4] : memref<1x128xf32, #tpu.memory_space<vmem>>, vector<1x128xf32>
    %4 = vector.broadcast %3 : vector<1x128xf32> to vector<8x128xf32>
    %5 = arith.addf %2, %4 : vector<8x128xf32>
    %cst_5 = arith.constant 0.000000e+00 : f32
    %6 = vector.broadcast %cst_5 : f32 to vector<8x128xf32>
    %7 = arith.maximumf %5, %6 : vector<8x128xf32>
    %c0_6 = arith.constant 0 : index
    %c0_7 = arith.constant 0 : index
    %8 = vector.load %arg5[%c0_6, %c0_7] : memref<128x256xf32, #tpu.memory_space<vmem>>, vector<128x256xf32>
    %cst_8 = arith.constant dense<0.000000e+00> : vector<8x256xf32>
    %9 = tpu.matmul %7, %8, %cst_8 {dimension_numbers = #tpu.dot_dimension_numbers<[1], [0], [0], [1], [0, 0, 1, 1], [], []>} : vector<8x128xf32>, vector<128x256xf32>, vector<8x256xf32> -> vector<8x256xf32>
    %c0_9 = arith.constant 0 : index
    %c0_10 = arith.constant 0 : index
    %10 = vector.load %arg6[%c0_9, %c0_10] : memref<1x256xf32, #tpu.memory_space<vmem>>, vector<1x256xf32>
    %11 = vector.broadcast %10 : vector<1x256xf32> to vector<8x256xf32>
    %12 = arith.addf %9, %11 : vector<8x256xf32>
    %13 = vector.extract_strided_slice %12 {offsets = [0, 0], sizes = [8, 128], strides = [1, 1]} : vector<8x256xf32> to vector<8x128xf32>
    %14 = vector.extract_strided_slice %12 {offsets = [0, 128], sizes = [8, 128], strides = [1, 1]} : vector<8x256xf32> to vector<8x128xf32>
    %cst_11 = arith.constant 5.000000e-01 : f32
    %15 = vector.broadcast %cst_11 : f32 to vector<8x128xf32>
    %16 = arith.mulf %15, %14 : vector<8x128xf32>
    %17 = math.exp %16 : vector<8x128xf32>
    %c0_12 = arith.constant 0 : index
    %c0_13 = arith.constant 0 : index
    %18 = vector.load %arg2[%c0_12, %c0_13] : memref<8x128xf32, #tpu.memory_space<vmem>>, vector<8x128xf32>
    %19 = arith.mulf %18, %17 : vector<8x128xf32>
    %20 = arith.addf %13, %19 : vector<8x128xf32>
    %c0_14 = arith.constant 0 : index
    %c0_15 = arith.constant 0 : index
    %21 = vector.load %arg7[%c0_14, %c0_15] : memref<128x128xf32, #tpu.memory_space<vmem>>, vector<128x128xf32>
    %cst_16 = arith.constant dense<0.000000e+00> : vector<8x128xf32>
    %22 = tpu.matmul %20, %21, %cst_16 {dimension_numbers = #tpu.dot_dimension_numbers<[1], [0], [0], [1], [0, 0, 1, 1], [], []>} : vector<8x128xf32>, vector<128x128xf32>, vector<8x128xf32> -> vector<8x128xf32>
    %c0_17 = arith.constant 0 : index
    %c0_18 = arith.constant 0 : index
    %23 = vector.load %arg8[%c0_17, %c0_18] : memref<1x128xf32, #tpu.memory_space<vmem>>, vector<1x128xf32>
    %24 = vector.broadcast %23 : vector<1x128xf32> to vector<8x128xf32>
    %25 = arith.addf %22, %24 : vector<8x128xf32>
    %cst_19 = arith.constant 0.000000e+00 : f32
    %26 = vector.broadcast %cst_19 : f32 to vector<8x128xf32>
    %27 = arith.maximumf %25, %26 : vector<8x128xf32>
    %c0_20 = arith.constant 0 : index
    %c0_21 = arith.constant 0 : index
    %28 = vector.load %arg9[%c0_20, %c0_21] : memref<128x128xf32, #tpu.memory_space<vmem>>, vector<128x128xf32>
    %cst_22 = arith.constant dense<0.000000e+00> : vector<8x128xf32>
    %29 = tpu.matmul %27, %28, %cst_22 {dimension_numbers = #tpu.dot_dimension_numbers<[1], [0], [0], [1], [0, 0, 1, 1], [], []>} : vector<8x128xf32>, vector<128x128xf32>, vector<8x128xf32> -> vector<8x128xf32>
    %c0_23 = arith.constant 0 : index
    %c0_24 = arith.constant 0 : index
    %30 = vector.load %arg10[%c0_23, %c0_24] : memref<1x128xf32, #tpu.memory_space<vmem>>, vector<1x128xf32>
    %31 = vector.broadcast %30 : vector<1x128xf32> to vector<8x128xf32>
    %32 = arith.addf %29, %31 : vector<8x128xf32>
    %33 = arith.negf %32 : vector<8x128xf32>
    %34 = math.exp %33 : vector<8x128xf32>
    %cst_25 = arith.constant 1.000000e+00 : f32
    %35 = vector.broadcast %cst_25 : f32 to vector<8x128xf32>
    %36 = arith.addf %35, %34 : vector<8x128xf32>
    %37 = arith.divf %35, %36 : vector<8x128xf32>
    %c0_26 = arith.constant 0 : index
    %c0_27 = arith.constant 0 : index
    %38 = vector.load %arg11[%c0_26, %c0_27] : memref<8x128xf32, #tpu.memory_space<vmem>>, vector<8x128xf32>
    tpu.vector_store %arg11[%c0_26, %c0_27], %37 {strides = array<i32>} : memref<8x128xf32, #tpu.memory_space<vmem>>, vector<8x128xf32>,
    %c0_28 = arith.constant 0 : index
    %c0_29 = arith.constant 0 : index
    %39 = vector.load %arg12[%c0_28, %c0_29] : memref<8x256xf32, #tpu.memory_space<vmem>>, vector<8x256xf32>
    tpu.vector_store %arg12[%c0_28, %c0_29], %12 {strides = array<i32>} : memref<8x256xf32, #tpu.memory_space<vmem>>, vector<8x256xf32>,
    return
  }
  func.func @transform_0(%arg0: i32) -> (i32, i32) {
    %c0_i32 = arith.constant 0 : i32
    %c0_i32_0 = arith.constant 0 : i32
    return %arg0, %c0_i32 : i32, i32
  }
  func.func @transform_1(%arg0: i32) -> (i32, i32) {
    %c0_i32 = arith.constant 0 : i32
    %c0_i32_0 = arith.constant 0 : i32
    return %arg0, %c0_i32 : i32, i32
  }
  func.func @transform_2(%arg0: i32) -> (i32, i32) {
    %c0_i32 = arith.constant 0 : i32
    %c0_i32_0 = arith.constant 0 : i32
    %c0_i32_1 = arith.constant 0 : i32
    return %c0_i32, %c0_i32_0 : i32, i32
  }
  func.func @transform_3(%arg0: i32) -> (i32, i32) {
    %c0_i32 = arith.constant 0 : i32
    %c0_i32_0 = arith.constant 0 : i32
    %c0_i32_1 = arith.constant 0 : i32
    return %c0_i32, %c0_i32_0 : i32, i32
  }
  func.func @transform_4(%arg0: i32) -> (i32, i32) {
    %c0_i32 = arith.constant 0 : i32
    %c0_i32_0 = arith.constant 0 : i32
    %c0_i32_1 = arith.constant 0 : i32
    return %c0_i32, %c0_i32_0 : i32, i32
  }
  func.func @transform_5(%arg0: i32) -> (i32, i32) {
    %c0_i32 = arith.constant 0 : i32
    %c0_i32_0 = arith.constant 0 : i32
    %c0_i32_1 = arith.constant 0 : i32
    return %c0_i32, %c0_i32_0 : i32, i32
  }
  func.func @transform_6(%arg0: i32) -> (i32, i32) {
    %c0_i32 = arith.constant 0 : i32
    %c0_i32_0 = arith.constant 0 : i32
    %c0_i32_1 = arith.constant 0 : i32
    return %c0_i32, %c0_i32_0 : i32, i32
  }
  func.func @transform_7(%arg0: i32) -> (i32, i32) {
    %c0_i32 = arith.constant 0 : i32
    %c0_i32_0 = arith.constant 0 : i32
    %c0_i32_1 = arith.constant 0 : i32
    return %c0_i32, %c0_i32_0 : i32, i32
  }
  func.func @transform_8(%arg0: i32) -> (i32, i32) {
    %c0_i32 = arith.constant 0 : i32
    %c0_i32_0 = arith.constant 0 : i32
    %c0_i32_1 = arith.constant 0 : i32
    return %c0_i32, %c0_i32_0 : i32, i32
  }
  func.func @transform_9(%arg0: i32) -> (i32, i32) {
    %c0_i32 = arith.constant 0 : i32
    %c0_i32_0 = arith.constant 0 : i32
    %c0_i32_1 = arith.constant 0 : i32
    return %c0_i32, %c0_i32_0 : i32, i32
  }
  func.func @transform_10(%arg0: i32) -> (i32, i32) {
    %c0_i32 = arith.constant 0 : i32
    %c0_i32_0 = arith.constant 0 : i32
    return %arg0, %c0_i32 : i32, i32
  }
  func.func @transform_11(%arg0: i32) -> (i32, i32) {
    %c0_i32 = arith.constant 0 : i32
    %c0_i32_0 = arith.constant 0 : i32
    return %arg0, %c0_i32 : i32, i32
  }
}

module attributes {stable_mosaic.version = 11 : i64} {
  func.func @_vae_kernel(%arg0: i32, %arg1: memref<8x128xf32, #tpu.memory_space<vmem>>, %arg2: memref<8x128xf32, #tpu.memory_space<vmem>>, %arg3: memref<128x128xf32, #tpu.memory_space<vmem>>, %arg4: memref<1x128xf32, #tpu.memory_space<vmem>>, %arg5: memref<128x256xf32, #tpu.memory_space<vmem>>, %arg6: memref<1x256xf32, #tpu.memory_space<vmem>>, %arg7: memref<128x128xf32, #tpu.memory_space<vmem>>, %arg8: memref<1x128xf32, #tpu.memory_space<vmem>>, %arg9: memref<128x128xf32, #tpu.memory_space<vmem>>, %arg10: memref<1x128xf32, #tpu.memory_space<vmem>>, %arg11: memref<8x128xf32, #tpu.memory_space<vmem>>, %arg12: memref<8x256xf32, #tpu.memory_space<vmem>>) attributes {dimension_semantics = [#tpu.dimension_semantics<parallel>], iteration_bounds = array<i64: 2>, scalar_prefetch = 0 : i64, scratch_operands = 0 : i64, tpu.core_type = #tpu.core_type<tc>, window_params = [{transform_indices = @transform_0, window_bounds = array<i64: 8, 128>}, {transform_indices = @transform_1, window_bounds = array<i64: 8, 128>}, {pipeline_mode = #tpu.pipeline_mode<synchronous>, transform_indices = @transform_2, window_bounds = array<i64: 128, 128>}, {pipeline_mode = #tpu.pipeline_mode<synchronous>, transform_indices = @transform_3, window_bounds = array<i64: 1, 128>}, {pipeline_mode = #tpu.pipeline_mode<synchronous>, transform_indices = @transform_4, window_bounds = array<i64: 128, 256>}, {pipeline_mode = #tpu.pipeline_mode<synchronous>, transform_indices = @transform_5, window_bounds = array<i64: 1, 256>}, {pipeline_mode = #tpu.pipeline_mode<synchronous>, transform_indices = @transform_6, window_bounds = array<i64: 128, 128>}, {pipeline_mode = #tpu.pipeline_mode<synchronous>, transform_indices = @transform_7, window_bounds = array<i64: 1, 128>}, {pipeline_mode = #tpu.pipeline_mode<synchronous>, transform_indices = @transform_8, window_bounds = array<i64: 128, 128>}, {pipeline_mode = #tpu.pipeline_mode<synchronous>, transform_indices = @transform_9, window_bounds = array<i64: 1, 128>}, {transform_indices = @transform_10, window_bounds = array<i64: 8, 128>}, {transform_indices = @transform_11, window_bounds = array<i64: 8, 256>}]} {
    %c0 = arith.constant 0 : index
    %c0_0 = arith.constant 0 : index
    %0 = vector.load %arg1[%c0, %c0_0] : memref<8x128xf32, #tpu.memory_space<vmem>>, vector<8x128xf32>
    %c0_1 = arith.constant 0 : index
    %c0_2 = arith.constant 0 : index
    %1 = vector.load %arg3[%c0_1, %c0_2] : memref<128x128xf32, #tpu.memory_space<vmem>>, vector<128x128xf32>
    %cst = arith.constant dense<0.000000e+00> : vector<8x128xf32>
    %2 = tpu.matmul %0, %1, %cst {dimension_numbers = #tpu.dot_dimension_numbers<[1], [0], [0], [1], [0, 0, 1, 1], [], []>} : vector<8x128xf32>, vector<128x128xf32>, vector<8x128xf32> -> vector<8x128xf32>
    %c0_3 = arith.constant 0 : index
    %c0_4 = arith.constant 0 : index
    %3 = vector.load %arg4[%c0_3, %c0_4] : memref<1x128xf32, #tpu.memory_space<vmem>>, vector<1x128xf32>
    %4 = vector.broadcast %3 : vector<1x128xf32> to vector<8x128xf32>
    %5 = arith.addf %2, %4 : vector<8x128xf32>
    %cst_5 = arith.constant 0.000000e+00 : f32
    %6 = vector.broadcast %cst_5 : f32 to vector<8x128xf32>
    %7 = arith.maximumf %5, %6 : vector<8x128xf32>
    %c0_6 = arith.constant 0 : index
    %c0_7 = arith.constant 0 : index
    %8 = vector.load %arg5[%c0_6, %c0_7] : memref<128x256xf32, #tpu.memory_space<vmem>>, vector<128x256xf32>
    %cst_8 = arith.constant dense<0.000000e+00> : vector<8x256xf32>
    %9 = tpu.matmul %7, %8, %cst_8 {dimension_numbers = #tpu.dot_dimension_numbers<[1], [0], [0], [1], [0, 0, 1, 1], [], []>} : vector<8x128xf32>, vector<128x256xf32>, vector<8x256xf32> -> vector<8x256xf32>
    %c0_9 = arith.constant 0 : index
    %c0_10 = arith.constant 0 : index
    %10 = vector.load %arg6[%c0_9, %c0_10] : memref<1x256xf32, #tpu.memory_space<vmem>>, vector<1x256xf32>
    %11 = vector.broadcast %10 : vector<1x256xf32> to vector<8x256xf32>
    %12 = arith.addf %9, %11 : vector<8x256xf32>
    %13 = vector.extract_strided_slice %12 {offsets = [0, 0], sizes = [8, 128], strides = [1, 1]} : vector<8x256xf32> to vector<8x128xf32>
    %14 = vector.extract_strided_slice %12 {offsets = [0, 128], sizes = [8, 128], strides = [1, 1]} : vector<8x256xf32> to vector<8x128xf32>
    %cst_11 = arith.constant 5.000000e-01 : f32
    %15 = vector.broadcast %cst_11 : f32 to vector<8x128xf32>
    %16 = arith.mulf %15, %14 : vector<8x128xf32>
    %17 = math.exp %16 : vector<8x128xf32>
    %c0_12 = arith.constant 0 : index
    %c0_13 = arith.constant 0 : index
    %18 = vector.load %arg2[%c0_12, %c0_13] : memref<8x128xf32, #tpu.memory_space<vmem>>, vector<8x128xf32>
    %19 = arith.mulf %18, %17 : vector<8x128xf32>
    %20 = arith.addf %13, %19 : vector<8x128xf32>
    %c0_14 = arith.constant 0 : index
    %c0_15 = arith.constant 0 : index
    %21 = vector.load %arg7[%c0_14, %c0_15] : memref<128x128xf32, #tpu.memory_space<vmem>>, vector<128x128xf32>
    %cst_16 = arith.constant dense<0.000000e+00> : vector<8x128xf32>
    %22 = tpu.matmul %20, %21, %cst_16 {dimension_numbers = #tpu.dot_dimension_numbers<[1], [0], [0], [1], [0, 0, 1, 1], [], []>} : vector<8x128xf32>, vector<128x128xf32>, vector<8x128xf32> -> vector<8x128xf32>
    %c0_17 = arith.constant 0 : index
    %c0_18 = arith.constant 0 : index
    %23 = vector.load %arg8[%c0_17, %c0_18] : memref<1x128xf32, #tpu.memory_space<vmem>>, vector<1x128xf32>
    %24 = vector.broadcast %23 : vector<1x128xf32> to vector<8x128xf32>
    %25 = arith.addf %22, %24 : vector<8x128xf32>
    %cst_19 = arith.constant 0.000000e+00 : f32
    %26 = vector.broadcast %cst_19 : f32 to vector<8x128xf32>
    %27 = arith.maximumf %25, %26 : vector<8x128xf32>
    %c0_20 = arith.constant 0 : index
    %c0_21 = arith.constant 0 : index
    %28 = vector.load %arg9[%c0_20, %c0_21] : memref<128x128xf32, #tpu.memory_space<vmem>>, vector<128x128xf32>
    %cst_22 = arith.constant dense<0.000000e+00> : vector<8x128xf32>
    %29 = tpu.matmul %27, %28, %cst_22 {dimension_numbers = #tpu.dot_dimension_numbers<[1], [0], [0], [1], [0, 0, 1, 1], [], []>} : vector<8x128xf32>, vector<128x128xf32>, vector<8x128xf32> -> vector<8x128xf32>
    %c0_23 = arith.constant 0 : index
    %c0_24 = arith.constant 0 : index
    %30 = vector.load %arg10[%c0_23, %c0_24] : memref<1x128xf32, #tpu.memory_space<vmem>>, vector<1x128xf32>
    %31 = vector.broadcast %30 : vector<1x128xf32> to vector<8x128xf32>
    %32 = arith.addf %29, %31 : vector<8x128xf32>
    %33 = arith.negf %32 : vector<8x128xf32>
    %34 = math.exp %33 : vector<8x128xf32>
    %cst_25 = arith.constant 1.000000e+00 : f32
    %35 = vector.broadcast %cst_25 : f32 to vector<8x128xf32>
    %36 = arith.addf %35, %34 : vector<8x128xf32>
    %37 = arith.divf %35, %36 : vector<8x128xf32>
    %c0_26 = arith.constant 0 : index
    %c0_27 = arith.constant 0 : index
    %38 = vector.load %arg11[%c0_26, %c0_27] : memref<8x128xf32, #tpu.memory_space<vmem>>, vector<8x128xf32>
    tpu.vector_store %arg11[%c0_26, %c0_27], %37 {strides = array<i32>} : memref<8x128xf32, #tpu.memory_space<vmem>>, vector<8x128xf32>,
    %c0_28 = arith.constant 0 : index
    %c0_29 = arith.constant 0 : index
    %39 = vector.load %arg12[%c0_28, %c0_29] : memref<8x256xf32, #tpu.memory_space<vmem>>, vector<8x256xf32>
    tpu.vector_store %arg12[%c0_28, %c0_29], %12 {strides = array<i32>} : memref<8x256xf32, #tpu.memory_space<vmem>>, vector<8x256xf32>,
    return
  }
  func.func @transform_0(%arg0: i32) -> (i32, i32) {
    %c0_i32 = arith.constant 0 : i32
    %c0_i32_0 = arith.constant 0 : i32
    return %arg0, %c0_i32 : i32, i32
  }
  func.func @transform_1(%arg0: i32) -> (i32, i32) {
    %c0_i32 = arith.constant 0 : i32
    %c0_i32_0 = arith.constant 0 : i32
    return %arg0, %c0_i32 : i32, i32
  }
  func.func @transform_2(%arg0: i32) -> (i32, i32) {
    %c0_i32 = arith.constant 0 : i32
    %c0_i32_0 = arith.constant 0 : i32
    %c0_i32_1 = arith.constant 0 : i32
    return %c0_i32, %c0_i32_0 : i32, i32
  }
  func.func @transform_3(%arg0: i32) -> (i32, i32) {
    %c0_i32 = arith.constant 0 : i32
    %c0_i32_0 = arith.constant 0 : i32
    %c0_i32_1 = arith.constant 0 : i32
    return %c0_i32, %c0_i32_0 : i32, i32
  }
  func.func @transform_4(%arg0: i32) -> (i32, i32) {
    %c0_i32 = arith.constant 0 : i32
    %c0_i32_0 = arith.constant 0 : i32
    %c0_i32_1 = arith.constant 0 : i32
    return %c0_i32, %c0_i32_0 : i32, i32
  }
  func.func @transform_5(%arg0: i32) -> (i32, i32) {
    %c0_i32 = arith.constant 0 : i32
    %c0_i32_0 = arith.constant 0 : i32
    %c0_i32_1 = arith.constant 0 : i32
    return %c0_i32, %c0_i32_0 : i32, i32
  }
  func.func @transform_6(%arg0: i32) -> (i32, i32) {
    %c0_i32 = arith.constant 0 : i32
    %c0_i32_0 = arith.constant 0 : i32
    %c0_i32_1 = arith.constant 0 : i32
    return %c0_i32, %c0_i32_0 : i32, i32
  }
  func.func @transform_7(%arg0: i32) -> (i32, i32) {
    %c0_i32 = arith.constant 0 : i32
    %c0_i32_0 = arith.constant 0 : i32
    %c0_i32_1 = arith.constant 0 : i32
    return %c0_i32, %c0_i32_0 : i32, i32
  }
  func.func @transform_8(%arg0: i32) -> (i32, i32) {
    %c0_i32 = arith.constant 0 : i32
    %c0_i32_0 = arith.constant 0 : i32
    %c0_i32_1 = arith.constant 0 : i32
    return %c0_i32, %c0_i32_0 : i32, i32
  }
  func.func @transform_9(%arg0: i32) -> (i32, i32) {
    %c0_i32 = arith.constant 0 : i32
    %c0_i32_0 = arith.constant 0 : i32
    %c0_i32_1 = arith.constant 0 : i32
    return %c0_i32, %c0_i32_0 : i32, i32
  }
  func.func @transform_10(%arg0: i32) -> (i32, i32) {
    %c0_i32 = arith.constant 0 : i32
    %c0_i32_0 = arith.constant 0 : i32
    return %arg0, %c0_i32 : i32, i32
  }
  func.func @transform_11(%arg0: i32) -> (i32, i32) {
    %c0_i32 = arith.constant 0 : i32
    %c0_i32_0 = arith.constant 0 : i32
    return %arg0, %c0_i32 : i32, i32
  }
}

</mosaic_0001>

<bundles_post_ra>
// kernel: tpu_custom_call.1
= control target key start
LH: loop header
LB: loop body
LE: loop exit
PB: predicated region body
PF: predicated region fallthrough
CT: control target
= control target key end

     0   :  { %s1692_s0 = inlined_call_operand.hbm [shape: f32[16,128], index: 0, kind: input, shape index: {}]   ;;  %s1693_s1 = inlined_call_operand.hbm [shape: f32[16,128], index: 1, kind: input, shape index: {}]   ;;  %s1694_s2 = inlined_call_operand.hbm [shape: f32[128,128], index: 2, kind: input, shape index: {}]   ;;  %s1695_s3 = inlined_call_operand.vmem [shape: f32[1,128], index: 3, kind: input, shape index: {}]   ;;  %s1696_s4 = inlined_call_operand.hbm [shape: f32[128,256], index: 4, kind: input, shape index: {}]   ;;  %s1697_s5 = inlined_call_operand.vmem [shape: f32[1,256], index: 5, kind: input, shape index: {}]   ;;  %s1698_s6 = inlined_call_operand.hbm [shape: f32[128,128], index: 6, kind: input, shape index: {}]   ;;  %s1699_s7 = inlined_call_operand.vmem [shape: f32[1,128], index: 7, kind: input, shape index: {}]   ;;  %s1700_s8 = inlined_call_operand.hbm [shape: f32[128,128], index: 8, kind: input, shape index: {}]   ;;  %s1701_s9 = inlined_call_operand.vmem [shape: f32[1,128], index: 9, kind: input, shape index: {}]   ;;  %s1702_s10 = inlined_call_operand.hbm [shape: f32[16,128], index: 10, kind: output, shape index: {0}]   ;;  %s1703_s11 = inlined_call_operand.hbm [shape: f32[16,256], index: 11, kind: output, shape index: {1}]  }
   0x1   :  { %1710 = sst [smem:[#allocation29_spill]] %s1694_s2 }
   0x2   :  { %1711 = sst [smem:[#allocation30_spill]] %s1696_s4 }
   0x3   :  { %1712 = sst [smem:[#allocation31_spill]] %s1698_s6 }
   0x4   :  { %1713 = sst [smem:[#allocation32_spill]] %s1700_s8 }
   0x5   :  { %17 = vsyncpa [#allocation3], 0 }
   0x6   :  { %19 = vsyncpa [#allocation3 + $0x1], 0 }
   0x7   :  { %20 = vsyncpa [#allocation6], 0 }
   0x8   :  { %22 = vsyncpa [#allocation6 + $0x1], 0 }
   0x9   :  { %23 = vsyncpa [#allocation9], 0 }
   0xa   :  { %24 = vsyncpa [#allocation12], 0 }
   0xb   :  { %25 = vsyncpa [#allocation4], 0 }
   0xc   :  { %27 = vsyncpa [#allocation4 + $0x1], 0 }
   0xd   :  { %28 = vsyncpa [#allocation15], 0 }
   0xe   :  { %30 = vsyncpa [#allocation15 + $0x1], 0  ;;  %s1452_s17 = smov 0   ;;  %s1454_s18 = smov 0  }
   0xf   :  { %s1456_s19 = smov 0   ;;  %s1458_s20 = smov 0  }
  0x10 LB: > { %1714 = sst [smem:[#allocation23_spill]] %s1370_s17  ;;  %s1476_s24 = sadd.s32 4294967295, %s1382_s20   ;;  %s1382_s20 = sphi %s1458_s20, %s1735_s20   ;;  %s1378_s19 = sphi %s1456_s19, %s1737_s19   ;;  %s1374_s18 = sphi %s1454_s18, %s1739_s18   ;;  %s1370_s17 = sphi %s1452_s17, %s1738_s17  }
  0x11   : > { %1715 = sst [smem:[#allocation24_spill]] %s1378_s19  ;;  %p950_p0 = scmp.ge.s32.totalorder %s1382_s20, 1 }
  0x12   : > { %1716 = sst [smem:[#allocation25_spill]] %s1382_s20  ;;  %p57_p1 = scmp.eq.s32.totalorder %s1476_s24, 0 }
  0x13   : > { %s1717_s2 = sld [smem:[#allocation29_spill]]  ;;  %p313_p2 = scmp.lt.s32.totalorder %s1382_s20, 3 }
  0x14   : > { %s1384_s26 = smov [#allocation7]   ;;  %s1719_s4 = sld [smem:[#allocation30_spill]] }
  0x15   : > { %p1481_p3 = pnand %p950_p0, %p313_p2  ;;  %s326_s27 = sshll.u32 %s1384_s26, 4  ;;  %s327_s27 = int_to_ptr.vmem [resolvable:$true] %s326_s27 }
  0x16   : > { %s1385_s13 = smov [#allocation8]   ;;  %s1386_s15 = smov 128  }
  0x17   : > { %p1002_p4 = pneg %p1481_p3  ;;  %s343_s14 = sshll.u32 %s1385_s13, 4  ;;  %s344_s14 = int_to_ptr.vmem [resolvable:$true] %s343_s14 }
  0x18   : > { %s1387_s16 = smov 8   ;;  %s1388_s21 = smov 256  }
  0x19   : > { %s324_s23 = sshll.u32 %s1717_s2, 4  ;;  %p1493_p6 = pnand %p1002_p4, %p57_p1  ;;  %s325_s23 = int_to_ptr.hbm [resolvable:$true] %s324_s23 }
  0x1a   : > { %s341_s30 = sshll.u32 %s1719_s4, 4  ;;  %s1389_s22 = smov 16   ;;  %s342_s30 = int_to_ptr.hbm [resolvable:$true] %s341_s30 }
  0x1b   : > { %1005 = dma.hbm_to_vmem [thread:$0]  (!%p1493_p6), %s325_s23, 2048, %s327_s27, [#allocation6], %s1386_s15, %s1386_s15, %s1387_s16  }
  0x1c   : > { %1008 = dma.hbm_to_vmem [thread:$0]  (!%p1493_p6), %s342_s30, 4096, %s344_s14, [#allocation9], %s1388_s21, %s1388_s21, %s1389_s22  }
  0x1d   : > { %s1721_s6 = sld [smem:[#allocation31_spill]]  ;;  %s1390_s13 = smov [#allocation10]  }
  0x1e   : > { %s360_s23 = sshll.u32 %s1390_s13, 4  ;;  %s1722_s8 = sld [smem:[#allocation32_spill]]  ;;  %s361_s23 = int_to_ptr.vmem [resolvable:$true] %s360_s23 }
  0x1f   : > { %s1391_s30 = smov [#allocation11]   ;;  %s949_s21 = sadd.s32 4294967294, %s1382_s20  }
  0x20   : > { %s377_s14 = sshll.u32 %s1391_s30, 4  ;;  %s1513_s22 = sadd.s32 1, %s1382_s20   ;;  %s378_s14 = int_to_ptr.vmem [resolvable:$true] %s377_s14 }
  0x21   : > { %1723 = sst [smem:[#allocation26_spill]] %s1513_s22  ;;  %s40_s26 = ssub.s32 %s1382_s20, %s1513_s22 }
  0x22   : > { %s43_s2 = sadd.s32 1, %s1378_s19  ;;  %p41_p7 = scmp.eq.s32.totalorder %s40_s26, 0 }
  0x23   : > { %s358_s29 = sshll.u32 %s1721_s6, 4  ;;  %p50_p8 = scmp.ne.s32.totalorder %s1378_s19, %s1374_s18  ;;  %s359_s29 = int_to_ptr.hbm [resolvable:$true] %s358_s29 }
  0x24   : > { %s375_s4 = sshll.u32 %s1722_s8, 4  ;;  %p51_p9 = scmp.eq.s32.totalorder %s1382_s20, 0  ;;  %s376_s4 = int_to_ptr.hbm [resolvable:$true] %s375_s4 }
  0x25   : > { %1011 = dma.hbm_to_vmem [thread:$0]  (!%p1493_p6), %s359_s29, 2048, %s361_s23, [#allocation9], %s1386_s15, %s1386_s15, %s1387_s16  }
  0x26   : > { %1014 = dma.hbm_to_vmem [thread:$0]  (!%p1493_p6), %s376_s4, 2048, %s378_s14, [#allocation12], %s1386_s15, %s1386_s15, %s1387_s16  }
  0x27   : > { %p56_p10 = scmp.ne.s32.totalorder %s1374_s18, %s1370_s17  ;;  %p1526_p11 = por %p51_p9, %p50_p8 }
  0x28   : > { %s1524_s28 = scalar_select %p41_p7, %s1378_s19, %s43_s2  }
  0x29   : > { %p1532_p12 = por %p57_p1, %p56_p10  ;;  %p274_p13 = scmp.eq.s32.totalorder %s1476_s24, 1 }
  0x2a   : > { %1724 = sst [smem:[#allocation27_spill]] %s1524_s28  ;;  %p280_p0 = scmp.eq.s32.totalorder %s949_s21, 1 }
  0x2b   : > { %p1033_p2 = scmp.lt.s32.totalorder %s1382_s20, 2  ;;  %s394_s12 = sand.u32 1, %s1378_s19  }
  0x2c   : > { %p1539_p4 = por %p274_p13, %p50_p8  ;;  %p1543_p6 = por %p280_p0, %p56_p10 }
  0x2d   : > { %s1547_s13 = sshll.u32 %s394_s12, 3  ;;  %s957_s23 = sshll.u32 %s1382_s20, 3 }
  0x2e   : > { %s1728_s16 = scalar_select %p1543_p6, 1, 0 }
  0x2f   : > { %s402_s14 = scalar_lea.hbm %s1692_s0, %s957_s23  ;;  %s398_s26 = scalar_lea.vmem [#allocation2], %s1547_s13 }
  0x30   : > { %1729 = sst [smem:[#allocation28_spill]] %s1728_s16  ;;  %s406_s21 = sshll.u32 %s398_s26, 4  ;;  %s407_s21 = int_to_ptr.vmem [resolvable:$true] %s406_s21 }
  0x31   : > { %s404_s2 = sshll.u32 %s402_s14, 4  ;;  %p1556_p7 = pnand %p1033_p2, %p1526_p11  ;;  %s405_s2 = int_to_ptr.hbm [resolvable:$true] %s404_s2 }
  0x32   : > { %s421_s19 = scalar_lea.hbm %s1693_s1, %s957_s23  ;;  %s413_s22 = sand.u32 1, %s1382_s20  }
  0x33   : > { %s395_s16 = scalar_lea.sflag [#allocation3], %s394_s12  ;;  %s1208_s27 = sshra.s32 %s405_s2, 4  ;;  %s1209_s27 = int_to_ptr.hbm [resolvable:$true] %s1208_s27 }
  0x34   : > { %s1210_s30 = scalar_lea.hbm %s1209_s27, 8  ;;  %p1212_p9 = pneg %p1556_p7 }
  0x35   : > { %p1211_p8 = scmp.ne.s32.totalorder %s1209_s27, %s1210_s30  ;;  %s1215_s26 = scalar_lea.hbm %s1692_s0, 16 }
  0x36   : > { %p1216_p13 = scmp.lt.s32.totalorder %s1209_s27, %s1692_s0  ;;  %p1217_p0 = scmp.lt.s32.totalorder %s1215_s26, %s1210_s30 }
  0x37   : > { %p1213_p10 = pnand %p1212_p9, %p1211_p8 }
  0x38   : > { %p1218_p2 = por %p1217_p0, %p1216_p13 }
  0x39   : > { %p1214_p11 = pneg %p1213_p10 }
  0x3b   : > { %p1219_p5 = pnand %p1218_p2, %p1214_p11 }
  0x3d   : > { %1222 = shalt.err (!%p1219_p5)
}
  0x3e   : > { %1018 = dma.hbm_to_vmem [thread:$0]  (!%p1556_p7), %s405_s2, 128, %s407_s21, %s395_s16  }
  0x3f   : > { %s423_s12 = sshll.u32 %s421_s19, 4  ;;  %s417_s23 = scalar_lea.vmem [#allocation5], %s1547_s13  ;;  %s424_s12 = int_to_ptr.hbm [resolvable:$true] %s423_s12 }
  0x40   : > { %s425_s20 = sshll.u32 %s417_s23, 4  ;;  %s414_s29 = scalar_lea.sflag [#allocation6], %s413_s22  ;;  %s426_s20 = int_to_ptr.vmem [resolvable:$true] %s425_s20 }
  0x41   : > { %s1238_s14 = sshra.s32 %s424_s12, 4  ;;  %s1245_s26 = scalar_lea.hbm %s1693_s1, 16  ;;  %s1239_s14 = int_to_ptr.hbm [resolvable:$true] %s1238_s14 }
  0x42   : > { %s1240_s17 = scalar_lea.hbm %s1239_s14, 8  ;;  %p1246_p5 = scmp.lt.s32.totalorder %s1239_s14, %s1693_s1 }
  0x43   : > { %p1241_p8 = scmp.ne.s32.totalorder %s1239_s14, %s1240_s17  ;;  %p1247_p13 = scmp.lt.s32.totalorder %s1245_s26, %s1240_s17 }
  0x45   : > { %p1243_p10 = pnand %p1241_p8, %p1212_p9  ;;  %p1248_p0 = por %p1247_p13, %p1246_p5 }
  0x47   : > { %p1244_p11 = pneg %p1243_p10 }
  0x49   : > { %p1249_p2 = pnand %p1248_p0, %p1244_p11 }
  0x4b   : > { %1252 = shalt.err (!%p1249_p2)
}
  0x4c   : > { %1021 = dma.hbm_to_vmem [thread:$0]  (!%p1556_p7), %s424_s12, 128, %s426_s20, %s414_s29  }
  0x4d   : > { %434 = sbr.rel (%p1481_p3) target bundleno = 698 (0x2ba), region = 60  ;;  %s1592_s19 = sand.u32 (!%p1481_p3), 1, %s1374_s18  }
  0x4e   : > { %s1595_s22 = sshll.u32 (!%p1481_p3), %s1592_s19, 3  ;;  %s437_s13 = scalar_lea.sflag (!%p1481_p3), [#allocation3], %s1592_s19 }
  0x4f   : > { %s440_s17 = scalar_lea.vmem (!%p1481_p3), [#allocation2], %s1595_s22 }
  0x52   : > { %1341 = dma.done.wait (%p1532_p12), %s437_s13, 128  }
  0x53   : > { %1343 = vsyncadd (%p1532_p12), %s437_s13, 4294967168  ;;  %s446_s6 = sand.u32 1, %s1476_s24   ;;  %s450_s25 = scalar_lea.vmem [#allocation5], %s1595_s22 }
  0x54   : > { %s447_s20 = scalar_lea.sflag [#allocation6], %s446_s6 }
  0x55   : > { %1345 = dma.done.wait (%p1532_p12), %s447_s20, 128  }
  0x56   : > { %1347 = vsyncadd (%p1532_p12), %s447_s20, 4294967168 }
  0x57   : > { %1349 = dma.done.wait (%p57_p1), [#allocation6], 2048  }
  0x58   : > { %1351 = vsyncadd (%p57_p1), [#allocation6], 4294965248 }
  0x59   : > { %1353 = dma.done.wait (%p57_p1), [#allocation9], 6144  }
  0x5a   : > { %1355 = vsyncadd (%p57_p1), [#allocation9], 4294961152 }
  0x5b   : > { %1357 = dma.done.wait (%p57_p1), [#allocation12], 2048  }
  0x5c   : > { %1359 = vsyncadd (%p57_p1), [#allocation12], 4294965248  ;;  %v536_v0 = vld [vmem:[#allocation7 + $0x78] sm:$0xff]  ;;  %v535_v1 = vld [vmem:[#allocation7 + $0x70] sm:$0xff]  ;;  %s968_s12 = sshll.u32 %s1592_s19, 4  ;;  %s977_s27 = sshll.u32 %s1476_s24, 4 }
  0x5d   : > { %541 = vmatpush.msra.mxu0 %v536_v0  ;;  %v534_v2 = vld [vmem:[#allocation7 + $0x68] sm:$0xff]  ;;  %v533_v3 = vld [vmem:[#allocation7 + $0x60] sm:$0xff]  ;;  %v532_v4 = vld [vmem:[#allocation7 + $0x58] sm:$0xff]  ;;  %s1630_s23 = scalar_lea.vmem [#allocation14], %s968_s12  ;;  %s780_s8 = scalar_lea.hbm %s1703_s11, %s977_s27 }
  0x5e   : > { %v592_v5 = vld [vmem:[#allocation8 + $0xf0] sm:$0xff]  ;;  %v593_v6 = vld [vmem:[#allocation8 + $0xf8] sm:$0xff]  ;;  %v590_v7 = vld [vmem:[#allocation8 + $0xe0] sm:$0xff]  ;;  %s782_s16 = sshll.u32 %s1630_s23, 4  ;;  %s784_s13 = sshll.u32 %s780_s8, 4  ;;  %s783_s16 = int_to_ptr.vmem [resolvable:$true] %s782_s16  ;;  %s785_s13 = int_to_ptr.hbm [resolvable:$true] %s784_s13 }
  0x5f   : > { %542 = vmatpush.msra.mxu0 %v535_v1  ;;  %600 = vmatpush.msra.mxu1 %v592_v5  ;;  %v591_v8 = vld [vmem:[#allocation8 + $0xe8] sm:$0xff]  ;;  %v588_v9 = vld [vmem:[#allocation8 + $0xd0] sm:$0xff]  ;;  %v589_v11 = vld [vmem:[#allocation8 + $0xd8] sm:$0xff]  ;;  %s1282_s6 = sshra.s32 %s785_s13, 4  ;;  %s1288_s21 = scalar_lea.hbm %s1703_s11, 32  ;;  %s1283_s6 = int_to_ptr.hbm [resolvable:$true] %s1282_s6 }
  0x60   : > { %620 = vmatpush.msra.mxu2 %v593_v6  ;;  %v531_v10 = vld [vmem:[#allocation7 + $0x50] sm:$0xff]  ;;  %v586_v12 = vld [vmem:[#allocation8 + $0xc0] sm:$0xff]  ;;  %v530_v13 = vld [vmem:[#allocation7 + $0x48] sm:$0xff]  ;;  %s1284_s20 = scalar_lea.hbm %s1283_s6, 16  ;;  %p1289_p7 = scmp.lt.s32.totalorder %s1283_s6, %s1703_s11 }
  0x61   : > { %543 = vmatpush.msra.mxu0 %v534_v2  ;;  %601 = vmatpush.msra.mxu1 %v590_v7  ;;  %v587_v14 = vld [vmem:[#allocation8 + $0xc8] sm:$0xff]  ;;  %v584_v15 = vld [vmem:[#allocation8 + $0xb0] sm:$0xff]  ;;  %v529_v16 = vld [vmem:[#allocation7 + $0x40] sm:$0xff]  ;;  %p1285_p1 = scmp.ne.s32.totalorder %s1283_s6, %s1284_s20  ;;  %p1290_p9 = scmp.lt.s32.totalorder %s1288_s21, %s1284_s20 }
  0x62   : > { %621 = vmatpush.msra.mxu2 %v591_v8  ;;  %v585_v17 = vld [vmem:[#allocation8 + $0xb8] sm:$0xff]  ;;  %v582_v18 = vld [vmem:[#allocation8 + $0xa0] sm:$0xff]  ;;  %v583_v20 = vld [vmem:[#allocation8 + $0xa8] sm:$0xff] }
  0x63   : > { %544 = vmatpush.msra.mxu0 %v533_v3  ;;  %602 = vmatpush.msra.mxu1 %v588_v9  ;;  %v528_v19 = vld [vmem:[#allocation7 + $0x38] sm:$0xff]  ;;  %v580_v21 = vld [vmem:[#allocation8 + $0x90] sm:$0xff]  ;;  %v578_v24 = vld [vmem:[#allocation8 + $0x80] sm:$0xff]  ;;  %p1286_p3 = pnand %p1285_p1, %p1539_p4  ;;  %p1291_p8 = por %p1290_p9, %p1289_p7 }
  0x64   : > { %622 = vmatpush.msra.mxu2 %v589_v11  ;;  %v527_v22 = vld [vmem:[#allocation7 + $0x30] sm:$0xff]  ;;  %v581_v23 = vld [vmem:[#allocation8 + $0x98] sm:$0xff]  ;;  %v526_v25 = vld [vmem:[#allocation7 + $0x28] sm:$0xff] }
  0x65   : > { %545 = vmatpush.msra.mxu0 %v532_v4  ;;  %603 = vmatpush.msra.mxu1 %v586_v12  ;;  %v579_v26 = vld [vmem:[#allocation8 + $0x88] sm:$0xff]  ;;  %v576_v27 = vld [vmem:[#allocation8 + $0x70] sm:$0xff]  ;;  %v525_v28 = vld [vmem:[#allocation7 + $0x20] sm:$0xff]  ;;  %p1287_p12 = pneg %p1286_p3 }
  0x66   : > { %623 = vmatpush.msra.mxu2 %v587_v14  ;;  %v577_v29 = vld [vmem:[#allocation8 + $0x78] sm:$0xff]  ;;  %v574_v30 = vld [vmem:[#allocation8 + $0x60] sm:$0xff]  ;;  %v575_v32 = vld [vmem:[#allocation8 + $0x68] sm:$0xff] }
  0x67   : > { %546 = vmatpush.msra.mxu0 %v531_v10  ;;  %604 = vmatpush.msra.mxu1 %v584_v15  ;;  %v524_v31 = vld [vmem:[#allocation7 + $0x18] sm:$0xff]  ;;  %v572_v33 = vld [vmem:[#allocation8 + $0x50] sm:$0xff]  ;;  %v570_v36 = vld [vmem:[#allocation8 + $0x40] sm:$0xff]  ;;  %p1292_p10 = pnand %p1291_p8, %p1287_p12 }
  0x68   : > { %624 = vmatpush.msra.mxu2 %v585_v17  ;;  %v523_v34 = vld [vmem:[#allocation7 + $0x10] sm:$0xff]  ;;  %v573_v35 = vld [vmem:[#allocation8 + $0x58] sm:$0xff]  ;;  %v522_v37 = vld [vmem:[#allocation7 + $0x8] sm:$0xff] }
  0x69   : > { %547 = vmatpush.msra.mxu0 %v530_v13  ;;  %605 = vmatpush.msra.mxu1 %v582_v18  ;;  %v571_v38 = vld [vmem:[#allocation8 + $0x48] sm:$0xff]  ;;  %v568_v39 = vld [vmem:[#allocation8 + $0x30] sm:$0xff]  ;;  %v521_v40 = vld [vmem:[#allocation7] sm:$0xff] }
  0x6a   : > { %625 = vmatpush.msra.mxu2 %v583_v20  ;;  %v569_v41 = vld [vmem:[#allocation8 + $0x38] sm:$0xff]  ;;  %v520_v42 = vld [vmem:[%s440_s17] sm:$0xff]  ;;  %v564_v45 = vld [vmem:[#allocation8 + $0x10] sm:$0xff]  ;;  %s755_s17 = scalar_lea.sflag [#allocation15], %s1592_s19 }
  0x6b   : > { %548 = vmatpush.msra.mxu0 %v529_v16  ;;  %606 = vmatpush.msra.mxu1 %v580_v21  ;;  %v566_v43 = vld [vmem:[#allocation8 + $0x20] sm:$0xff]  ;;  %v567_v44 = vld [vmem:[#allocation8 + $0x28] sm:$0xff]  ;;  %v565_v46 = vld [vmem:[#allocation8 + $0x18] sm:$0xff] }
  0x6c   : > { %626 = vmatpush.msra.mxu2 %v581_v23  ;;  %v562_v47 = vld [vmem:[#allocation8] sm:$0xff]  ;;  %v563_v48 = vld [vmem:[#allocation8 + $0x8] sm:$0xff]  ;;  %v661_v49 = vld [vmem:[#allocation10 + $0x78] sm:$0xff] }
  0x6d   : > { %549 = vmatpush.msra.mxu0 %v528_v19  ;;  %607 = vmatpush.msra.mxu1 %v578_v24  ;;  %v660_v50 = vld [vmem:[#allocation10 + $0x70] sm:$0xff]  ;;  %v659_v51 = vld [vmem:[#allocation10 + $0x68] sm:$0xff]  ;;  %v658_v52 = vld [vmem:[#allocation10 + $0x60] sm:$0xff] }
  0x6e   : > { %627 = vmatpush.msra.mxu2 %v579_v26  ;;  %666 = vmatpush.msra.mxu3 %v661_v49  ;;  %v1079_v53 = vld [vmem:[%s1695_s3] ss:$0 sm:$0xff]  ;;  %v657_v57 = vld [vmem:[#allocation10 + $0x58] sm:$0xff]  ;;  %v656_v58 = vld [vmem:[#allocation10 + $0x50] sm:$0xff] }
  0x6f   : > { %550 = vmatpush.msra.mxu0 %v527_v22  ;;  %608 = vmatpush.msra.mxu1 %v576_v27  ;;  %v655_v59 = vld [vmem:[#allocation10 + $0x48] sm:$0xff]  ;;  %v654_v60 = vld [vmem:[#allocation10 + $0x40] sm:$0xff]  ;;  %v653_v61 = vld [vmem:[#allocation10 + $0x38] sm:$0xff] }
  0x70   : > { %628 = vmatpush.msra.mxu2 %v577_v29  ;;  %667 = vmatpush.msra.mxu3 %v660_v50  ;;  %v652_v62 = vld [vmem:[#allocation10 + $0x30] sm:$0xff]  ;;  %v651_v63 = vld [vmem:[#allocation10 + $0x28] sm:$0xff]  ;;  %v650_v0 = vld [vmem:[#allocation10 + $0x20] sm:$0xff] }
  0x71   : > { %551 = vmatpush.msra.mxu0 %v526_v25  ;;  %609 = vmatpush.msra.mxu1 %v574_v30  ;;  %v649_v1 = vld [vmem:[#allocation10 + $0x18] sm:$0xff]  ;;  %v648_v2 = vld [vmem:[#allocation10 + $0x10] sm:$0xff]  ;;  %v647_v3 = vld [vmem:[#allocation10 + $0x8] sm:$0xff] }
  0x72   : > { %629 = vmatpush.msra.mxu2 %v575_v32  ;;  %668 = vmatpush.msra.mxu3 %v659_v51  ;;  %v646_v4 = vld [vmem:[#allocation10] sm:$0xff]  ;;  %v702_v5 = vld [vmem:[#allocation11 + $0x78] sm:$0xff]  ;;  %v701_v6 = vld [vmem:[#allocation11 + $0x70] sm:$0xff] }
  0x73   : > { %552 = vmatpush.msra.mxu0 %v525_v28  ;;  %610 = vmatpush.msra.mxu1 %v572_v33  ;;  %v594_v7 = vld [vmem:[%s1697_s5] sm:$0x3]  ;;  %v700_v8 = vld [vmem:[#allocation11 + $0x68] sm:$0xff]  ;;  %v698_v11 = vld [vmem:[#allocation11 + $0x58] sm:$0xff] }
  0x74   : > { %630 = vmatpush.msra.mxu2 %v573_v35  ;;  %669 = vmatpush.msra.mxu3 %v658_v52  ;;  %v699_v9 = vld [vmem:[#allocation11 + $0x60] sm:$0xff]  ;;  %v596_v10 = vperm.slane %v594_v7, 0  ;;  %v697_v13 = vld [vmem:[#allocation11 + $0x50] sm:$0xff]  ;;  %v696_v15 = vld [vmem:[#allocation11 + $0x48] sm:$0xff]  ;;  %v597_v16 = vperm.slane %v594_v7, 1 }
  0x75   : > { %553 = vmatpush.msra.mxu0 %v524_v31  ;;  %611 = vmatpush.msra.mxu1 %v570_v36  ;;  %v695_v17 = vld [vmem:[#allocation11 + $0x40] sm:$0xff]  ;;  %v694_v19 = vld [vmem:[#allocation11 + $0x38] sm:$0xff]  ;;  %v693_v21 = vld [vmem:[#allocation11 + $0x30] sm:$0xff] }
  0x76   : > { %631 = vmatpush.msra.mxu2 %v571_v38  ;;  %670 = vmatpush.msra.mxu3 %v657_v57  ;;  %v692_v23 = vld [vmem:[#allocation11 + $0x28] sm:$0xff]  ;;  %v691_v25 = vld [vmem:[#allocation11 + $0x20] sm:$0xff]  ;;  %v690_v26 = vld [vmem:[#allocation11 + $0x18] sm:$0xff] }
  0x77   : > { %554 = vmatpush.msra.mxu0 %v523_v34  ;;  %612 = vmatpush.msra.mxu1 %v568_v39  ;;  %v643_v27 = vld [vmem:[%s450_s25] sm:$0xff]  ;;  %v688_v32 = vld [vmem:[#allocation11 + $0x8] sm:$0xff]  ;;  %v687_v33 = vld [vmem:[#allocation11] sm:$0xff] }
  0x78   : > { %632 = vmatpush.msra.mxu2 %v569_v41  ;;  %671 = vmatpush.msra.mxu3 %v656_v58  ;;  %v689_v31 = vld [vmem:[#allocation11 + $0x10] sm:$0xff]  ;;  %v1080_v34 = vld [vmem:[%s1699_s7] ss:$0 sm:$0xff] }
  0x79   : > { %555 = vmatpush.msra.mxu0 %v522_v37  ;;  %613 = vmatpush.msra.mxu1 %v566_v43 }
  0x7a   : > { %633 = vmatpush.msra.mxu2 %v567_v44  ;;  %672 = vmatpush.msra.mxu3 %v655_v59 }
  0x7b   : > { %556 = vmatpush.msra.mxu0 %v521_v40  ;;  %614 = vmatpush.msra.mxu1 %v564_v45 }
  0x7c   : > { %557 = vmatmul.f32.vlgmr.msra.gmra.mxu0 %v520_v42  ;;  %634 = vmatpush.msra.mxu2 %v565_v46 }
  0x7d   : > { %615 = vmatpush.msra.mxu1 %v562_v47  ;;  %673 = vmatpush.msra.mxu3 %v654_v60 }
  0x7e   : > { %635 = vmatpush.msra.mxu2 %v563_v48  ;;  %707 = vmatpush.msrb.mxu0 %v702_v5 }
  0x7f   : > { %674 = vmatpush.msra.mxu3 %v653_v61 }
  0x80   : > { %708 = vmatpush.msrb.mxu0 %v701_v6 }
  0x81   : > { %675 = vmatpush.msra.mxu3 %v652_v62 }
  0x82   : > { %709 = vmatpush.msrb.mxu0 %v700_v8 }
  0x83   : > { %676 = vmatpush.msra.mxu3 %v651_v63 }
  0x84   : > { %710 = vmatpush.msrb.mxu0 %v699_v9 }
  0x85   : > { %677 = vmatpush.msra.mxu3 %v650_v0 }
  0x86   : > { %711 = vmatpush.msrb.mxu0 %v698_v11 }
  0x87   : > { %678 = vmatpush.msra.mxu3 %v649_v1 }
  0x88   : > { %712 = vmatpush.msrb.mxu0 %v697_v13 }
  0x89   : > { %679 = vmatpush.msra.mxu3 %v648_v2 }
  0x8a   : > { %713 = vmatpush.msrb.mxu0 %v696_v15 }
  0x8b   : > { %680 = vmatpush.msra.mxu3 %v647_v3 }
  0x8c   : > { %714 = vmatpush.msrb.mxu0 %v695_v17 }
  0x8d   : > { %681 = vmatpush.msra.mxu3 %v646_v4 }
  0x8e   : > { %715 = vmatpush.msrb.mxu0 %v694_v19 }
  0x90   : > { %716 = vmatpush.msrb.mxu0 %v693_v21 }
  0x92   : > { %717 = vmatpush.msrb.mxu0 %v692_v23 }
  0x94   : > { %718 = vmatpush.msrb.mxu0 %v691_v25 }
  0x96   : > { %719 = vmatpush.msrb.mxu0 %v690_v26 }
  0x98   : > { %720 = vmatpush.msrb.mxu0 %v689_v31 }
  0x9a   : > { %721 = vmatpush.msrb.mxu0 %v688_v32 }
  0x9c   : > { %722 = vmatpush.msrb.mxu0 %v687_v33 }
  0xf9   : > { %v558_v54 = vpop.f32.mrf.mxu0 }
  0xfa   : > { %v559_v55 = vadd.f32 %v1079_v53, %v558_v54 }
  0xfc   : > { %v561_v56 = vmax.f32 %v559_v55, 0.0 }
  0xfe   : > { %616 = vmatmul.f32.vlgmr.msra.gmra.mxu1 %v561_v56  ;;  %636 = vmatmul.f32.vlgmr.msra.gmra.mxu2 %v561_v56 }
 0x17b   : > { %v617_v12 = vpop.f32.mrf.mxu1 }
 0x17c   : > { %v618_v14 = vadd.f32 %v617_v12, %v596_v10 }
 0x17e   : > { %747 = vst [vmem:[%s1630_s23] sm:$0xff] %v618_v14 }
 0x181   : > { %v637_v18 = vpop.f32.mrf.mxu2 }
 0x182   : > { %v638_v20 = vadd.f32 %v637_v18, %v597_v16 }
 0x184   : > { %v640_v22 = vmul.f32 0.5, %v638_v20  ;;  %748 = vst [vmem:[%s1630_s23 + $0x8] sm:$0xff] %v638_v20 }
 0x186   : > { %v641_v24 = vmul.f32 1.442695, %v640_v22 }
 0x188   : > { %1082 = vpow2.f32 %v641_v24 }
 0x18e   : > { %v1083_v28 = vpop.eup %1082 }
 0x18f   : > { %v644_v29 = vmul.f32 %v1083_v28, %v643_v27 }
 0x191   : > { %v645_v30 = vadd.f32 %v644_v29, %v618_v14 }
 0x193   : > { %682 = vmatmul.f32.vlgmr.msra.gmra.mxu3 %v645_v30 }
 0x216   : > { %v683_v35 = vpop.f32.mrf.mxu3 }
 0x217   : > { %v684_v36 = vadd.f32 %v1080_v34, %v683_v35 }
 0x219   : > { %v686_v37 = vmax.f32 %v684_v36, 0.0 }
 0x21b   : > { %723 = vmatmul.f32.vlgmr.msrb.gmra.mxu0 %v686_v37 }
 0x21c   : > { %1295 = shalt.err (!%p1292_p10)
}
 0x21d   : > { %999 = dma.vmem_to_hbm [thread:$0]  (%p1539_p4), %s783_s16, 256, %s785_s13, %s755_s17   ;;  %v1081_v38 = vld [vmem:[%s1701_s9] ss:$0 sm:$0xff] }
 0x21e   : > { %s972_s29 = sshll.u32 %s1476_s24, 3  ;;  %s512_s26 = scalar_lea.vmem [#allocation13], %s1595_s22 }
 0x21f   : > { %s765_s30 = scalar_lea.hbm %s1702_s10, %s972_s29  ;;  %s767_s8 = sshll.u32 %s512_s26, 4  ;;  %s768_s8 = int_to_ptr.vmem [resolvable:$true] %s767_s8 }
 0x220   : > { %s769_s16 = sshll.u32 %s765_s30, 4  ;;  %s750_s24 = scalar_lea.sflag [#allocation4], %s1592_s19  ;;  %s770_s16 = int_to_ptr.hbm [resolvable:$true] %s769_s16 }
 0x221   : > { %s1310_s13 = sshra.s32 %s770_s16, 4  ;;  %s1316_s20 = scalar_lea.hbm %s1702_s10, 16  ;;  %s1311_s13 = int_to_ptr.hbm [resolvable:$true] %s1310_s13 }
 0x222   : > { %s1312_s17 = scalar_lea.hbm %s1311_s13, 8  ;;  %p1317_p0 = scmp.lt.s32.totalorder %s1311_s13, %s1702_s10 }
 0x223   : > { %p1313_p11 = scmp.ne.s32.totalorder %s1311_s13, %s1312_s17  ;;  %p1318_p2 = scmp.lt.s32.totalorder %s1316_s20, %s1312_s17 }
 0x225   : > { %p1314_p5 = pnand %p1313_p11, %p1539_p4  ;;  %p1319_p1 = por %p1318_p2, %p1317_p0 }
 0x227   : > { %p1315_p13 = pneg %p1314_p5 }
 0x229   : > { %p1320_p3 = pnand %p1319_p1, %p1315_p13 }
 0x298   : > { %v724_v39 = vpop.f32.mrf.mxu0 }
 0x299   : > { %v725_v40 = vadd.f32 %v1081_v38, %v724_v39 }
 0x29b   : > { %v969_v41 = vmul.f32 -1.442695, %v725_v40 }
 0x29d   : > { %1084 = vpow2.f32 %v969_v41 }
 0x2a3   : > { %v1085_v42 = vpop.eup %1084 }
 0x2a4   : > { %v730_v43 = vadd.f32 1.0, %v1085_v42 }
 0x2a6   : > { %1086 = vrcp.f32 %v730_v43  ;;  %v742_v47 = vand.u32 2147483648, %v730_v43  ;;  %v740_v49 = vand.u32 2147483647, %v730_v43  ;;  %vm736_vm1 = vweird.f32 %v730_v43 }
 0x2a8   : > { %v743_v51 = vor.u32 1.1754944e-38, %v742_v47  ;;  %vm741_vm3 = vcmp.eq.f32.partialorder %v740_v49, 8.507059e+37 }
 0x2ac   : > { %v1087_v44 = vpop.eup %1086 }
 0x2ad   : > { %v732_v45 = vmul.f32 %v1087_v44, %v730_v43  ;;  %vm737_vm0 = vweird.f32 %v1087_v44 }
 0x2ae   : > { %vm738_vm2 = vmor %vm736_vm1, %vm737_vm0 }
 0x2af   : > { %v733_v46 = vsub.f32 1.0, %v732_v45 }
 0x2b1   : > { %v734_v48 = vmul.f32 %v1087_v44, %v733_v46 }
 0x2b3   : > { %v735_v50 = vadd.f32 %v1087_v44, %v734_v48 }
 0x2b5   : > { %v739_v52 = vsel %vm738_vm2, %v1087_v44, %v735_v50 }
 0x2b6   : > { %v744_v53 = vsel %vm741_vm3, %v743_v51, %v739_v52 }
 0x2b7   : > { %746 = vst [vmem:[%s512_s26] sm:$0xff] %v744_v53 }
 0x2b8   : > { %1323 = shalt.err (!%p1320_p3)
}
 0x2b9   : > { %998 = dma.vmem_to_hbm [thread:$0]  (%p1539_p4), %s768_s8, 128, %s770_s16, %s750_s24  }
 0x2ba PF: > { %s1731_s19 = sld [smem:[#allocation23_spill]] }
 0x2bb   : > { %s1733_s2 = sld [smem:[#allocation25_spill]] }
 0x2c0   : > { %s796_s28 = sand.u32 1, %s1731_s19  }
 0x2c1   : > { %p1734_p12 = scmp.ge.s32.totalorder %s1733_s2, 2  ;;  %s797_s12 = scalar_lea.sflag [#allocation4], %s796_s28 }
 0x2c3   : > { %p1023_p7 = pnand %p1734_p12, %p1543_p6 }
 0x2c5   : > { %p1024_p9 = pneg %p1023_p7 }
 0x2c7   : > { %1361 = dma.done.wait (%p1024_p9), %s797_s12, 128  }
 0x2c8   : > { %1363 = vsyncadd (%p1024_p9), %s797_s12, 4294967168  ;;  %s807_s23 = scalar_lea.sflag [#allocation15], %s796_s28 }
 0x2c9   : > { %1365 = dma.done.wait (%p1024_p9), %s807_s23, 256  }
 0x2ca   : > { %1367 = vsyncadd (%p1024_p9), %s807_s23, 4294967040  ;;  %s1735_s20 = sld [smem:[#allocation26_spill]]  ;;  %s1738_s17 = smov %s1374_s18 }
 0x2cb   : > { %s1736_s29 = sld [smem:[#allocation24_spill]] }
 0x2cc   : > { %s1737_s19 = sld [smem:[#allocation27_spill]] }
 0x2d0   : > { %p33_p4 = scmp.ge.s32.totalorder %s1735_s20, 4  }
 0x2d1   : > { %s1739_s18 = smov %s1736_s29 }
 0x2d2   :  { %35 = sbr.rel (!%p33_p4) target bundleno = 16 (0x10), region = 151 }
 0x2d7   :  { %813 = vsyncpa [#allocation3], 1 }
 0x2d8   :  { %815 = vsyncpa [#allocation3 + $0x1], 1 }
 0x2d9   :  { %816 = vsyncpa [#allocation6], 1 }
 0x2da   :  { %818 = vsyncpa [#allocation6 + $0x1], 1 }
 0x2db   :  { %819 = vsyncpa [#allocation9], 1 }
 0x2dc   :  { %820 = vsyncpa [#allocation12], 1 }
 0x2dd   :  { %821 = vsyncpa [#allocation4], 1 }
 0x2de   :  { %823 = vsyncpa [#allocation4 + $0x1], 1 }
 0x2df   :  { %824 = vsyncpa [#allocation15], 1 }
 0x2e0   :  { %826 = vsyncpa [#allocation15 + $0x1], 1 }

// kernel: tpu_custom_call.1
= control target key start
LH: loop header
LB: loop body
LE: loop exit
PB: predicated region body
PF: predicated region fallthrough
CT: control target
= control target key end

     0   :  { %s1692_s0 = inlined_call_operand.hbm [shape: f32[16,128], index: 0, kind: input, shape index: {}]   ;;  %s1693_s1 = inlined_call_operand.hbm [shape: f32[16,128], index: 1, kind: input, shape index: {}]   ;;  %s1694_s2 = inlined_call_operand.hbm [shape: f32[128,128], index: 2, kind: input, shape index: {}]   ;;  %s1695_s3 = inlined_call_operand.vmem [shape: f32[1,128], index: 3, kind: input, shape index: {}]   ;;  %s1696_s4 = inlined_call_operand.hbm [shape: f32[128,256], index: 4, kind: input, shape index: {}]   ;;  %s1697_s5 = inlined_call_operand.vmem [shape: f32[1,256], index: 5, kind: input, shape index: {}]   ;;  %s1698_s6 = inlined_call_operand.hbm [shape: f32[128,128], index: 6, kind: input, shape index: {}]   ;;  %s1699_s7 = inlined_call_operand.vmem [shape: f32[1,128], index: 7, kind: input, shape index: {}]   ;;  %s1700_s8 = inlined_call_operand.hbm [shape: f32[128,128], index: 8, kind: input, shape index: {}]   ;;  %s1701_s9 = inlined_call_operand.vmem [shape: f32[1,128], index: 9, kind: input, shape index: {}]   ;;  %s1702_s10 = inlined_call_operand.hbm [shape: f32[16,128], index: 10, kind: output, shape index: {0}]   ;;  %s1703_s11 = inlined_call_operand.hbm [shape: f32[16,256], index: 11, kind: output, shape index: {1}]  }
   0x1   :  { %1710 = sst [smem:[#allocation29_spill]] %s1694_s2 }
   0x2   :  { %1711 = sst [smem:[#allocation30_spill]] %s1696_s4 }
   0x3   :  { %1712 = sst [smem:[#allocation31_spill]] %s1698_s6 }
   0x4   :  { %1713 = sst [smem:[#allocation32_spill]] %s1700_s8 }
   0x5   :  { %17 = vsyncpa [#allocation3], 0 }
   0x6   :  { %19 = vsyncpa [#allocation3 + $0x1], 0 }
   0x7   :  { %20 = vsyncpa [#allocation6], 0 }
   0x8   :  { %22 = vsyncpa [#allocation6 + $0x1], 0 }
   0x9   :  { %23 = vsyncpa [#allocation9], 0 }
   0xa   :  { %24 = vsyncpa [#allocation12], 0 }
   0xb   :  { %25 = vsyncpa [#allocation4], 0 }
   0xc   :  { %27 = vsyncpa [#allocation4 + $0x1], 0 }
   0xd   :  { %28 = vsyncpa [#allocation15], 0 }
   0xe   :  { %30 = vsyncpa [#allocation15 + $0x1], 0  ;;  %s1452_s17 = smov 0   ;;  %s1454_s18 = smov 0  }
   0xf   :  { %s1456_s19 = smov 0   ;;  %s1458_s20 = smov 0  }
  0x10 LB: > { %1714 = sst [smem:[#allocation23_spill]] %s1370_s17  ;;  %s1476_s24 = sadd.s32 4294967295, %s1382_s20   ;;  %s1382_s20 = sphi %s1458_s20, %s1735_s20   ;;  %s1378_s19 = sphi %s1456_s19, %s1737_s19   ;;  %s1374_s18 = sphi %s1454_s18, %s1739_s18   ;;  %s1370_s17 = sphi %s1452_s17, %s1738_s17  }
  0x11   : > { %1715 = sst [smem:[#allocation24_spill]] %s1378_s19  ;;  %p950_p0 = scmp.ge.s32.totalorder %s1382_s20, 1 }
  0x12   : > { %1716 = sst [smem:[#allocation25_spill]] %s1382_s20  ;;  %p57_p1 = scmp.eq.s32.totalorder %s1476_s24, 0 }
  0x13   : > { %s1717_s2 = sld [smem:[#allocation29_spill]]  ;;  %p313_p2 = scmp.lt.s32.totalorder %s1382_s20, 3 }
  0x14   : > { %s1384_s26 = smov [#allocation7]   ;;  %s1719_s4 = sld [smem:[#allocation30_spill]] }
  0x15   : > { %p1481_p3 = pnand %p950_p0, %p313_p2  ;;  %s326_s27 = sshll.u32 %s1384_s26, 4  ;;  %s327_s27 = int_to_ptr.vmem [resolvable:$true] %s326_s27 }
  0x16   : > { %s1385_s13 = smov [#allocation8]   ;;  %s1386_s15 = smov 128  }
  0x17   : > { %p1002_p4 = pneg %p1481_p3  ;;  %s343_s14 = sshll.u32 %s1385_s13, 4  ;;  %s344_s14 = int_to_ptr.vmem [resolvable:$true] %s343_s14 }
  0x18   : > { %s1387_s16 = smov 8   ;;  %s1388_s21 = smov 256  }
  0x19   : > { %s324_s23 = sshll.u32 %s1717_s2, 4  ;;  %p1493_p6 = pnand %p1002_p4, %p57_p1  ;;  %s325_s23 = int_to_ptr.hbm [resolvable:$true] %s324_s23 }
  0x1a   : > { %s341_s30 = sshll.u32 %s1719_s4, 4  ;;  %s1389_s22 = smov 16   ;;  %s342_s30 = int_to_ptr.hbm [resolvable:$true] %s341_s30 }
  0x1b   : > { %1005 = dma.hbm_to_vmem [thread:$0]  (!%p1493_p6), %s325_s23, 2048, %s327_s27, [#allocation6], %s1386_s15, %s1386_s15, %s1387_s16  }
  0x1c   : > { %1008 = dma.hbm_to_vmem [thread:$0]  (!%p1493_p6), %s342_s30, 4096, %s344_s14, [#allocation9], %s1388_s21, %s1388_s21, %s1389_s22  }
  0x1d   : > { %s1721_s6 = sld [smem:[#allocation31_spill]]  ;;  %s1390_s13 = smov [#allocation10]  }
  0x1e   : > { %s360_s23 = sshll.u32 %s1390_s13, 4  ;;  %s1722_s8 = sld [smem:[#allocation32_spill]]  ;;  %s361_s23 = int_to_ptr.vmem [resolvable:$true] %s360_s23 }
  0x1f   : > { %s1391_s30 = smov [#allocation11]   ;;  %s949_s21 = sadd.s32 4294967294, %s1382_s20  }
  0x20   : > { %s377_s14 = sshll.u32 %s1391_s30, 4  ;;  %s1513_s22 = sadd.s32 1, %s1382_s20   ;;  %s378_s14 = int_to_ptr.vmem [resolvable:$true] %s377_s14 }
  0x21   : > { %1723 = sst [smem:[#allocation26_spill]] %s1513_s22  ;;  %s40_s26 = ssub.s32 %s1382_s20, %s1513_s22 }
  0x22   : > { %s43_s2 = sadd.s32 1, %s1378_s19  ;;  %p41_p7 = scmp.eq.s32.totalorder %s40_s26, 0 }
  0x23   : > { %s358_s29 = sshll.u32 %s1721_s6, 4  ;;  %p50_p8 = scmp.ne.s32.totalorder %s1378_s19, %s1374_s18  ;;  %s359_s29 = int_to_ptr.hbm [resolvable:$true] %s358_s29 }
  0x24   : > { %s375_s4 = sshll.u32 %s1722_s8, 4  ;;  %p51_p9 = scmp.eq.s32.totalorder %s1382_s20, 0  ;;  %s376_s4 = int_to_ptr.hbm [resolvable:$true] %s375_s4 }
  0x25   : > { %1011 = dma.hbm_to_vmem [thread:$0]  (!%p1493_p6), %s359_s29, 2048, %s361_s23, [#allocation9], %s1386_s15, %s1386_s15, %s1387_s16  }
  0x26   : > { %1014 = dma.hbm_to_vmem [thread:$0]  (!%p1493_p6), %s376_s4, 2048, %s378_s14, [#allocation12], %s1386_s15, %s1386_s15, %s1387_s16  }
  0x27   : > { %p56_p10 = scmp.ne.s32.totalorder %s1374_s18, %s1370_s17  ;;  %p1526_p11 = por %p51_p9, %p50_p8 }
  0x28   : > { %s1524_s28 = scalar_select %p41_p7, %s1378_s19, %s43_s2  }
  0x29   : > { %p1532_p12 = por %p57_p1, %p56_p10  ;;  %p274_p13 = scmp.eq.s32.totalorder %s1476_s24, 1 }
  0x2a   : > { %1724 = sst [smem:[#allocation27_spill]] %s1524_s28  ;;  %p280_p0 = scmp.eq.s32.totalorder %s949_s21, 1 }
  0x2b   : > { %p1033_p2 = scmp.lt.s32.totalorder %s1382_s20, 2  ;;  %s394_s12 = sand.u32 1, %s1378_s19  }
  0x2c   : > { %p1539_p4 = por %p274_p13, %p50_p8  ;;  %p1543_p6 = por %p280_p0, %p56_p10 }
  0x2d   : > { %s1547_s13 = sshll.u32 %s394_s12, 3  ;;  %s957_s23 = sshll.u32 %s1382_s20, 3 }
  0x2e   : > { %s1728_s16 = scalar_select %p1543_p6, 1, 0 }
  0x2f   : > { %s402_s14 = scalar_lea.hbm %s1692_s0, %s957_s23  ;;  %s398_s26 = scalar_lea.vmem [#allocation2], %s1547_s13 }
  0x30   : > { %1729 = sst [smem:[#allocation28_spill]] %s1728_s16  ;;  %s406_s21 = sshll.u32 %s398_s26, 4  ;;  %s407_s21 = int_to_ptr.vmem [resolvable:$true] %s406_s21 }
  0x31   : > { %s404_s2 = sshll.u32 %s402_s14, 4  ;;  %p1556_p7 = pnand %p1033_p2, %p1526_p11  ;;  %s405_s2 = int_to_ptr.hbm [resolvable:$true] %s404_s2 }
  0x32   : > { %s421_s19 = scalar_lea.hbm %s1693_s1, %s957_s23  ;;  %s413_s22 = sand.u32 1, %s1382_s20  }
  0x33   : > { %s395_s16 = scalar_lea.sflag [#allocation3], %s394_s12  ;;  %s1208_s27 = sshra.s32 %s405_s2, 4  ;;  %s1209_s27 = int_to_ptr.hbm [resolvable:$true] %s1208_s27 }
  0x34   : > { %s1210_s30 = scalar_lea.hbm %s1209_s27, 8  ;;  %p1212_p9 = pneg %p1556_p7 }
  0x35   : > { %p1211_p8 = scmp.ne.s32.totalorder %s1209_s27, %s1210_s30  ;;  %s1215_s26 = scalar_lea.hbm %s1692_s0, 16 }
  0x36   : > { %p1216_p13 = scmp.lt.s32.totalorder %s1209_s27, %s1692_s0  ;;  %p1217_p0 = scmp.lt.s32.totalorder %s1215_s26, %s1210_s30 }
  0x37   : > { %p1213_p10 = pnand %p1212_p9, %p1211_p8 }
  0x38   : > { %p1218_p2 = por %p1217_p0, %p1216_p13 }
  0x39   : > { %p1214_p11 = pneg %p1213_p10 }
  0x3b   : > { %p1219_p5 = pnand %p1218_p2, %p1214_p11 }
  0x3d   : > { %1222 = shalt.err (!%p1219_p5)
}
  0x3e   : > { %1018 = dma.hbm_to_vmem [thread:$0]  (!%p1556_p7), %s405_s2, 128, %s407_s21, %s395_s16  }
  0x3f   : > { %s423_s12 = sshll.u32 %s421_s19, 4  ;;  %s417_s23 = scalar_lea.vmem [#allocation5], %s1547_s13  ;;  %s424_s12 = int_to_ptr.hbm [resolvable:$true] %s423_s12 }
  0x40   : > { %s425_s20 = sshll.u32 %s417_s23, 4  ;;  %s414_s29 = scalar_lea.sflag [#allocation6], %s413_s22  ;;  %s426_s20 = int_to_ptr.vmem [resolvable:$true] %s425_s20 }
  0x41   : > { %s1238_s14 = sshra.s32 %s424_s12, 4  ;;  %s1245_s26 = scalar_lea.hbm %s1693_s1, 16  ;;  %s1239_s14 = int_to_ptr.hbm [resolvable:$true] %s1238_s14 }
  0x42   : > { %s1240_s17 = scalar_lea.hbm %s1239_s14, 8  ;;  %p1246_p5 = scmp.lt.s32.totalorder %s1239_s14, %s1693_s1 }
  0x43   : > { %p1241_p8 = scmp.ne.s32.totalorder %s1239_s14, %s1240_s17  ;;  %p1247_p13 = scmp.lt.s32.totalorder %s1245_s26, %s1240_s17 }
  0x45   : > { %p1243_p10 = pnand %p1241_p8, %p1212_p9  ;;  %p1248_p0 = por %p1247_p13, %p1246_p5 }
  0x47   : > { %p1244_p11 = pneg %p1243_p10 }
  0x49   : > { %p1249_p2 = pnand %p1248_p0, %p1244_p11 }
  0x4b   : > { %1252 = shalt.err (!%p1249_p2)
}
  0x4c   : > { %1021 = dma.hbm_to_vmem [thread:$0]  (!%p1556_p7), %s424_s12, 128, %s426_s20, %s414_s29  }
  0x4d   : > { %434 = sbr.rel (%p1481_p3) target bundleno = 698 (0x2ba), region = 60  ;;  %s1592_s19 = sand.u32 (!%p1481_p3), 1, %s1374_s18  }
  0x4e   : > { %s1595_s22 = sshll.u32 (!%p1481_p3), %s1592_s19, 3  ;;  %s437_s13 = scalar_lea.sflag (!%p1481_p3), [#allocation3], %s1592_s19 }
  0x4f   : > { %s440_s17 = scalar_lea.vmem (!%p1481_p3), [#allocation2], %s1595_s22 }
  0x52   : > { %1341 = dma.done.wait (%p1532_p12), %s437_s13, 128  }
  0x53   : > { %1343 = vsyncadd (%p1532_p12), %s437_s13, 4294967168  ;;  %s446_s6 = sand.u32 1, %s1476_s24   ;;  %s450_s25 = scalar_lea.vmem [#allocation5], %s1595_s22 }
  0x54   : > { %s447_s20 = scalar_lea.sflag [#allocation6], %s446_s6 }
  0x55   : > { %1345 = dma.done.wait (%p1532_p12), %s447_s20, 128  }
  0x56   : > { %1347 = vsyncadd (%p1532_p12), %s447_s20, 4294967168 }
  0x57   : > { %1349 = dma.done.wait (%p57_p1), [#allocation6], 2048  }
  0x58   : > { %1351 = vsyncadd (%p57_p1), [#allocation6], 4294965248 }
  0x59   : > { %1353 = dma.done.wait (%p57_p1), [#allocation9], 6144  }
  0x5a   : > { %1355 = vsyncadd (%p57_p1), [#allocation9], 4294961152 }
  0x5b   : > { %1357 = dma.done.wait (%p57_p1), [#allocation12], 2048  }
  0x5c   : > { %1359 = vsyncadd (%p57_p1), [#allocation12], 4294965248  ;;  %v536_v0 = vld [vmem:[#allocation7 + $0x78] sm:$0xff]  ;;  %v535_v1 = vld [vmem:[#allocation7 + $0x70] sm:$0xff]  ;;  %s968_s12 = sshll.u32 %s1592_s19, 4  ;;  %s977_s27 = sshll.u32 %s1476_s24, 4 }
  0x5d   : > { %541 = vmatpush.msra.mxu0 %v536_v0  ;;  %v534_v2 = vld [vmem:[#allocation7 + $0x68] sm:$0xff]  ;;  %v533_v3 = vld [vmem:[#allocation7 + $0x60] sm:$0xff]  ;;  %v532_v4 = vld [vmem:[#allocation7 + $0x58] sm:$0xff]  ;;  %s1630_s23 = scalar_lea.vmem [#allocation14], %s968_s12  ;;  %s780_s8 = scalar_lea.hbm %s1703_s11, %s977_s27 }
  0x5e   : > { %v592_v5 = vld [vmem:[#allocation8 + $0xf0] sm:$0xff]  ;;  %v593_v6 = vld [vmem:[#allocation8 + $0xf8] sm:$0xff]  ;;  %v590_v7 = vld [vmem:[#allocation8 + $0xe0] sm:$0xff]  ;;  %s782_s16 = sshll.u32 %s1630_s23, 4  ;;  %s784_s13 = sshll.u32 %s780_s8, 4  ;;  %s783_s16 = int_to_ptr.vmem [resolvable:$true] %s782_s16  ;;  %s785_s13 = int_to_ptr.hbm [resolvable:$true] %s784_s13 }
  0x5f   : > { %542 = vmatpush.msra.mxu0 %v535_v1  ;;  %600 = vmatpush.msra.mxu1 %v592_v5  ;;  %v591_v8 = vld [vmem:[#allocation8 + $0xe8] sm:$0xff]  ;;  %v588_v9 = vld [vmem:[#allocation8 + $0xd0] sm:$0xff]  ;;  %v589_v11 = vld [vmem:[#allocation8 + $0xd8] sm:$0xff]  ;;  %s1282_s6 = sshra.s32 %s785_s13, 4  ;;  %s1288_s21 = scalar_lea.hbm %s1703_s11, 32  ;;  %s1283_s6 = int_to_ptr.hbm [resolvable:$true] %s1282_s6 }
  0x60   : > { %620 = vmatpush.msra.mxu2 %v593_v6  ;;  %v531_v10 = vld [vmem:[#allocation7 + $0x50] sm:$0xff]  ;;  %v586_v12 = vld [vmem:[#allocation8 + $0xc0] sm:$0xff]  ;;  %v530_v13 = vld [vmem:[#allocation7 + $0x48] sm:$0xff]  ;;  %s1284_s20 = scalar_lea.hbm %s1283_s6, 16  ;;  %p1289_p7 = scmp.lt.s32.totalorder %s1283_s6, %s1703_s11 }
  0x61   : > { %543 = vmatpush.msra.mxu0 %v534_v2  ;;  %601 = vmatpush.msra.mxu1 %v590_v7  ;;  %v587_v14 = vld [vmem:[#allocation8 + $0xc8] sm:$0xff]  ;;  %v584_v15 = vld [vmem:[#allocation8 + $0xb0] sm:$0xff]  ;;  %v529_v16 = vld [vmem:[#allocation7 + $0x40] sm:$0xff]  ;;  %p1285_p1 = scmp.ne.s32.totalorder %s1283_s6, %s1284_s20  ;;  %p1290_p9 = scmp.lt.s32.totalorder %s1288_s21, %s1284_s20 }
  0x62   : > { %621 = vmatpush.msra.mxu2 %v591_v8  ;;  %v585_v17 = vld [vmem:[#allocation8 + $0xb8] sm:$0xff]  ;;  %v582_v18 = vld [vmem:[#allocation8 + $0xa0] sm:$0xff]  ;;  %v583_v20 = vld [vmem:[#allocation8 + $0xa8] sm:$0xff] }
  0x63   : > { %544 = vmatpush.msra.mxu0 %v533_v3  ;;  %602 = vmatpush.msra.mxu1 %v588_v9  ;;  %v528_v19 = vld [vmem:[#allocation7 + $0x38] sm:$0xff]  ;;  %v580_v21 = vld [vmem:[#allocation8 + $0x90] sm:$0xff]  ;;  %v578_v24 = vld [vmem:[#allocation8 + $0x80] sm:$0xff]  ;;  %p1286_p3 = pnand %p1285_p1, %p1539_p4  ;;  %p1291_p8 = por %p1290_p9, %p1289_p7 }
  0x64   : > { %622 = vmatpush.msra.mxu2 %v589_v11  ;;  %v527_v22 = vld [vmem:[#allocation7 + $0x30] sm:$0xff]  ;;  %v581_v23 = vld [vmem:[#allocation8 + $0x98] sm:$0xff]  ;;  %v526_v25 = vld [vmem:[#allocation7 + $0x28] sm:$0xff] }
  0x65   : > { %545 = vmatpush.msra.mxu0 %v532_v4  ;;  %603 = vmatpush.msra.mxu1 %v586_v12  ;;  %v579_v26 = vld [vmem:[#allocation8 + $0x88] sm:$0xff]  ;;  %v576_v27 = vld [vmem:[#allocation8 + $0x70] sm:$0xff]  ;;  %v525_v28 = vld [vmem:[#allocation7 + $0x20] sm:$0xff]  ;;  %p1287_p12 = pneg %p1286_p3 }
  0x66   : > { %623 = vmatpush.msra.mxu2 %v587_v14  ;;  %v577_v29 = vld [vmem:[#allocation8 + $0x78] sm:$0xff]  ;;  %v574_v30 = vld [vmem:[#allocation8 + $0x60] sm:$0xff]  ;;  %v575_v32 = vld [vmem:[#allocation8 + $0x68] sm:$0xff] }
  0x67   : > { %546 = vmatpush.msra.mxu0 %v531_v10  ;;  %604 = vmatpush.msra.mxu1 %v584_v15  ;;  %v524_v31 = vld [vmem:[#allocation7 + $0x18] sm:$0xff]  ;;  %v572_v33 = vld [vmem:[#allocation8 + $0x50] sm:$0xff]  ;;  %v570_v36 = vld [vmem:[#allocation8 + $0x40] sm:$0xff]  ;;  %p1292_p10 = pnand %p1291_p8, %p1287_p12 }
  0x68   : > { %624 = vmatpush.msra.mxu2 %v585_v17  ;;  %v523_v34 = vld [vmem:[#allocation7 + $0x10] sm:$0xff]  ;;  %v573_v35 = vld [vmem:[#allocation8 + $0x58] sm:$0xff]  ;;  %v522_v37 = vld [vmem:[#allocation7 + $0x8] sm:$0xff] }
  0x69   : > { %547 = vmatpush.msra.mxu0 %v530_v13  ;;  %605 = vmatpush.msra.mxu1 %v582_v18  ;;  %v571_v38 = vld [vmem:[#allocation8 + $0x48] sm:$0xff]  ;;  %v568_v39 = vld [vmem:[#allocation8 + $0x30] sm:$0xff]  ;;  %v521_v40 = vld [vmem:[#allocation7] sm:$0xff] }
  0x6a   : > { %625 = vmatpush.msra.mxu2 %v583_v20  ;;  %v569_v41 = vld [vmem:[#allocation8 + $0x38] sm:$0xff]  ;;  %v520_v42 = vld [vmem:[%s440_s17] sm:$0xff]  ;;  %v564_v45 = vld [vmem:[#allocation8 + $0x10] sm:$0xff]  ;;  %s755_s17 = scalar_lea.sflag [#allocation15], %s1592_s19 }
  0x6b   : > { %548 = vmatpush.msra.mxu0 %v529_v16  ;;  %606 = vmatpush.msra.mxu1 %v580_v21  ;;  %v566_v43 = vld [vmem:[#allocation8 + $0x20] sm:$0xff]  ;;  %v567_v44 = vld [vmem:[#allocation8 + $0x28] sm:$0xff]  ;;  %v565_v46 = vld [vmem:[#allocation8 + $0x18] sm:$0xff] }
  0x6c   : > { %626 = vmatpush.msra.mxu2 %v581_v23  ;;  %v562_v47 = vld [vmem:[#allocation8] sm:$0xff]  ;;  %v563_v48 = vld [vmem:[#allocation8 + $0x8] sm:$0xff]  ;;  %v661_v49 = vld [vmem:[#allocation10 + $0x78] sm:$0xff] }
  0x6d   : > { %549 = vmatpush.msra.mxu0 %v528_v19  ;;  %607 = vmatpush.msra.mxu1 %v578_v24  ;;  %v660_v50 = vld [vmem:[#allocation10 + $0x70] sm:$0xff]  ;;  %v659_v51 = vld [vmem:[#allocation10 + $0x68] sm:$0xff]  ;;  %v658_v52 = vld [vmem:[#allocation10 + $0x60] sm:$0xff] }
  0x6e   : > { %627 = vmatpush.msra.mxu2 %v579_v26  ;;  %666 = vmatpush.msra.mxu3 %v661_v49  ;;  %v1079_v53 = vld [vmem:[%s1695_s3] ss:$0 sm:$0xff]  ;;  %v657_v57 = vld [vmem:[#allocation10 + $0x58] sm:$0xff]  ;;  %v656_v58 = vld [vmem:[#allocation10 + $0x50] sm:$0xff] }
  0x6f   : > { %550 = vmatpush.msra.mxu0 %v527_v22  ;;  %608 = vmatpush.msra.mxu1 %v576_v27  ;;  %v655_v59 = vld [vmem:[#allocation10 + $0x48] sm:$0xff]  ;;  %v654_v60 = vld [vmem:[#allocation10 + $0x40] sm:$0xff]  ;;  %v653_v61 = vld [vmem:[#allocation10 + $0x38] sm:$0xff] }
  0x70   : > { %628 = vmatpush.msra.mxu2 %v577_v29  ;;  %667 = vmatpush.msra.mxu3 %v660_v50  ;;  %v652_v62 = vld [vmem:[#allocation10 + $0x30] sm:$0xff]  ;;  %v651_v63 = vld [vmem:[#allocation10 + $0x28] sm:$0xff]  ;;  %v650_v0 = vld [vmem:[#allocation10 + $0x20] sm:$0xff] }
  0x71   : > { %551 = vmatpush.msra.mxu0 %v526_v25  ;;  %609 = vmatpush.msra.mxu1 %v574_v30  ;;  %v649_v1 = vld [vmem:[#allocation10 + $0x18] sm:$0xff]  ;;  %v648_v2 = vld [vmem:[#allocation10 + $0x10] sm:$0xff]  ;;  %v647_v3 = vld [vmem:[#allocation10 + $0x8] sm:$0xff] }
  0x72   : > { %629 = vmatpush.msra.mxu2 %v575_v32  ;;  %668 = vmatpush.msra.mxu3 %v659_v51  ;;  %v646_v4 = vld [vmem:[#allocation10] sm:$0xff]  ;;  %v702_v5 = vld [vmem:[#allocation11 + $0x78] sm:$0xff]  ;;  %v701_v6 = vld [vmem:[#allocation11 + $0x70] sm:$0xff] }
  0x73   : > { %552 = vmatpush.msra.mxu0 %v525_v28  ;;  %610 = vmatpush.msra.mxu1 %v572_v33  ;;  %v594_v7 = vld [vmem:[%s1697_s5] sm:$0x3]  ;;  %v700_v8 = vld [vmem:[#allocation11 + $0x68] sm:$0xff]  ;;  %v698_v11 = vld [vmem:[#allocation11 + $0x58] sm:$0xff] }
  0x74   : > { %630 = vmatpush.msra.mxu2 %v573_v35  ;;  %669 = vmatpush.msra.mxu3 %v658_v52  ;;  %v699_v9 = vld [vmem:[#allocation11 + $0x60] sm:$0xff]  ;;  %v596_v10 = vperm.slane %v594_v7, 0  ;;  %v697_v13 = vld [vmem:[#allocation11 + $0x50] sm:$0xff]  ;;  %v696_v15 = vld [vmem:[#allocation11 + $0x48] sm:$0xff]  ;;  %v597_v16 = vperm.slane %v594_v7, 1 }
  0x75   : > { %553 = vmatpush.msra.mxu0 %v524_v31  ;;  %611 = vmatpush.msra.mxu1 %v570_v36  ;;  %v695_v17 = vld [vmem:[#allocation11 + $0x40] sm:$0xff]  ;;  %v694_v19 = vld [vmem:[#allocation11 + $0x38] sm:$0xff]  ;;  %v693_v21 = vld [vmem:[#allocation11 + $0x30] sm:$0xff] }
  0x76   : > { %631 = vmatpush.msra.mxu2 %v571_v38  ;;  %670 = vmatpush.msra.mxu3 %v657_v57  ;;  %v692_v23 = vld [vmem:[#allocation11 + $0x28] sm:$0xff]  ;;  %v691_v25 = vld [vmem:[#allocation11 + $0x20] sm:$0xff]  ;;  %v690_v26 = vld [vmem:[#allocation11 + $0x18] sm:$0xff] }
  0x77   : > { %554 = vmatpush.msra.mxu0 %v523_v34  ;;  %612 = vmatpush.msra.mxu1 %v568_v39  ;;  %v643_v27 = vld [vmem:[%s450_s25] sm:$0xff]  ;;  %v688_v32 = vld [vmem:[#allocation11 + $0x8] sm:$0xff]  ;;  %v687_v33 = vld [vmem:[#allocation11] sm:$0xff] }
  0x78   : > { %632 = vmatpush.msra.mxu2 %v569_v41  ;;  %671 = vmatpush.msra.mxu3 %v656_v58  ;;  %v689_v31 = vld [vmem:[#allocation11 + $0x10] sm:$0xff]  ;;  %v1080_v34 = vld [vmem:[%s1699_s7] ss:$0 sm:$0xff] }
  0x79   : > { %555 = vmatpush.msra.mxu0 %v522_v37  ;;  %613 = vmatpush.msra.mxu1 %v566_v43 }
  0x7a   : > { %633 = vmatpush.msra.mxu2 %v567_v44  ;;  %672 = vmatpush.msra.mxu3 %v655_v59 }
  0x7b   : > { %556 = vmatpush.msra.mxu0 %v521_v40  ;;  %614 = vmatpush.msra.mxu1 %v564_v45 }
  0x7c   : > { %557 = vmatmul.f32.vlgmr.msra.gmra.mxu0 %v520_v42  ;;  %634 = vmatpush.msra.mxu2 %v565_v46 }
  0x7d   : > { %615 = vmatpush.msra.mxu1 %v562_v47  ;;  %673 = vmatpush.msra.mxu3 %v654_v60 }
  0x7e   : > { %635 = vmatpush.msra.mxu2 %v563_v48  ;;  %707 = vmatpush.msrb.mxu0 %v702_v5 }
  0x7f   : > { %674 = vmatpush.msra.mxu3 %v653_v61 }
  0x80   : > { %708 = vmatpush.msrb.mxu0 %v701_v6 }
  0x81   : > { %675 = vmatpush.msra.mxu3 %v652_v62 }
  0x82   : > { %709 = vmatpush.msrb.mxu0 %v700_v8 }
  0x83   : > { %676 = vmatpush.msra.mxu3 %v651_v63 }
  0x84   : > { %710 = vmatpush.msrb.mxu0 %v699_v9 }
  0x85   : > { %677 = vmatpush.msra.mxu3 %v650_v0 }
  0x86   : > { %711 = vmatpush.msrb.mxu0 %v698_v11 }
  0x87   : > { %678 = vmatpush.msra.mxu3 %v649_v1 }
  0x88   : > { %712 = vmatpush.msrb.mxu0 %v697_v13 }
  0x89   : > { %679 = vmatpush.msra.mxu3 %v648_v2 }
  0x8a   : > { %713 = vmatpush.msrb.mxu0 %v696_v15 }
  0x8b   : > { %680 = vmatpush.msra.mxu3 %v647_v3 }
  0x8c   : > { %714 = vmatpush.msrb.mxu0 %v695_v17 }
  0x8d   : > { %681 = vmatpush.msra.mxu3 %v646_v4 }
  0x8e   : > { %715 = vmatpush.msrb.mxu0 %v694_v19 }
  0x90   : > { %716 = vmatpush.msrb.mxu0 %v693_v21 }
  0x92   : > { %717 = vmatpush.msrb.mxu0 %v692_v23 }
  0x94   : > { %718 = vmatpush.msrb.mxu0 %v691_v25 }
  0x96   : > { %719 = vmatpush.msrb.mxu0 %v690_v26 }
  0x98   : > { %720 = vmatpush.msrb.mxu0 %v689_v31 }
  0x9a   : > { %721 = vmatpush.msrb.mxu0 %v688_v32 }
  0x9c   : > { %722 = vmatpush.msrb.mxu0 %v687_v33 }
  0xf9   : > { %v558_v54 = vpop.f32.mrf.mxu0 }
  0xfa   : > { %v559_v55 = vadd.f32 %v1079_v53, %v558_v54 }
  0xfc   : > { %v561_v56 = vmax.f32 %v559_v55, 0.0 }
  0xfe   : > { %616 = vmatmul.f32.vlgmr.msra.gmra.mxu1 %v561_v56  ;;  %636 = vmatmul.f32.vlgmr.msra.gmra.mxu2 %v561_v56 }
 0x17b   : > { %v617_v12 = vpop.f32.mrf.mxu1 }
 0x17c   : > { %v618_v14 = vadd.f32 %v617_v12, %v596_v10 }
 0x17e   : > { %747 = vst [vmem:[%s1630_s23] sm:$0xff] %v618_v14 }
 0x181   : > { %v637_v18 = vpop.f32.mrf.mxu2 }
 0x182   : > { %v638_v20 = vadd.f32 %v637_v18, %v597_v16 }
 0x184   : > { %v640_v22 = vmul.f32 0.5, %v638_v20  ;;  %748 = vst [vmem:[%s1630_s23 + $0x8] sm:$0xff] %v638_v20 }
 0x186   : > { %v641_v24 = vmul.f32 1.442695, %v640_v22 }
 0x188   : > { %1082 = vpow2.f32 %v641_v24 }
 0x18e   : > { %v1083_v28 = vpop.eup %1082 }
 0x18f   : > { %v644_v29 = vmul.f32 %v1083_v28, %v643_v27 }
 0x191   : > { %v645_v30 = vadd.f32 %v644_v29, %v618_v14 }
 0x193   : > { %682 = vmatmul.f32.vlgmr.msra.gmra.mxu3 %v645_v30 }
 0x216   : > { %v683_v35 = vpop.f32.mrf.mxu3 }
 0x217   : > { %v684_v36 = vadd.f32 %v1080_v34, %v683_v35 }
 0x219   : > { %v686_v37 = vmax.f32 %v684_v36, 0.0 }
 0x21b   : > { %723 = vmatmul.f32.vlgmr.msrb.gmra.mxu0 %v686_v37 }
 0x21c   : > { %1295 = shalt.err (!%p1292_p10)
}
 0x21d   : > { %999 = dma.vmem_to_hbm [thread:$0]  (%p1539_p4), %s783_s16, 256, %s785_s13, %s755_s17   ;;  %v1081_v38 = vld [vmem:[%s1701_s9] ss:$0 sm:$0xff] }
 0x21e   : > { %s972_s29 = sshll.u32 %s1476_s24, 3  ;;  %s512_s26 = scalar_lea.vmem [#allocation13], %s1595_s22 }
 0x21f   : > { %s765_s30 = scalar_lea.hbm %s1702_s10, %s972_s29  ;;  %s767_s8 = sshll.u32 %s512_s26, 4  ;;  %s768_s8 = int_to_ptr.vmem [resolvable:$true] %s767_s8 }
 0x220   : > { %s769_s16 = sshll.u32 %s765_s30, 4  ;;  %s750_s24 = scalar_lea.sflag [#allocation4], %s1592_s19  ;;  %s770_s16 = int_to_ptr.hbm [resolvable:$true] %s769_s16 }
 0x221   : > { %s1310_s13 = sshra.s32 %s770_s16, 4  ;;  %s1316_s20 = scalar_lea.hbm %s1702_s10, 16  ;;  %s1311_s13 = int_to_ptr.hbm [resolvable:$true] %s1310_s13 }
 0x222   : > { %s1312_s17 = scalar_lea.hbm %s1311_s13, 8  ;;  %p1317_p0 = scmp.lt.s32.totalorder %s1311_s13, %s1702_s10 }
 0x223   : > { %p1313_p11 = scmp.ne.s32.totalorder %s1311_s13, %s1312_s17  ;;  %p1318_p2 = scmp.lt.s32.totalorder %s1316_s20, %s1312_s17 }
 0x225   : > { %p1314_p5 = pnand %p1313_p11, %p1539_p4  ;;  %p1319_p1 = por %p1318_p2, %p1317_p0 }
 0x227   : > { %p1315_p13 = pneg %p1314_p5 }
 0x229   : > { %p1320_p3 = pnand %p1319_p1, %p1315_p13 }
 0x298   : > { %v724_v39 = vpop.f32.mrf.mxu0 }
 0x299   : > { %v725_v40 = vadd.f32 %v1081_v38, %v724_v39 }
 0x29b   : > { %v969_v41 = vmul.f32 -1.442695, %v725_v40 }
 0x29d   : > { %1084 = vpow2.f32 %v969_v41 }
 0x2a3   : > { %v1085_v42 = vpop.eup %1084 }
 0x2a4   : > { %v730_v43 = vadd.f32 1.0, %v1085_v42 }
 0x2a6   : > { %1086 = vrcp.f32 %v730_v43  ;;  %v742_v47 = vand.u32 2147483648, %v730_v43  ;;  %v740_v49 = vand.u32 2147483647, %v730_v43  ;;  %vm736_vm1 = vweird.f32 %v730_v43 }
 0x2a8   : > { %v743_v51 = vor.u32 1.1754944e-38, %v742_v47  ;;  %vm741_vm3 = vcmp.eq.f32.partialorder %v740_v49, 8.507059e+37 }
 0x2ac   : > { %v1087_v44 = vpop.eup %1086 }
 0x2ad   : > { %v732_v45 = vmul.f32 %v1087_v44, %v730_v43  ;;  %vm737_vm0 = vweird.f32 %v1087_v44 }
 0x2ae   : > { %vm738_vm2 = vmor %vm736_vm1, %vm737_vm0 }
 0x2af   : > { %v733_v46 = vsub.f32 1.0, %v732_v45 }
 0x2b1   : > { %v734_v48 = vmul.f32 %v1087_v44, %v733_v46 }
 0x2b3   : > { %v735_v50 = vadd.f32 %v1087_v44, %v734_v48 }
 0x2b5   : > { %v739_v52 = vsel %vm738_vm2, %v1087_v44, %v735_v50 }
 0x2b6   : > { %v744_v53 = vsel %vm741_vm3, %v743_v51, %v739_v52 }
 0x2b7   : > { %746 = vst [vmem:[%s512_s26] sm:$0xff] %v744_v53 }
 0x2b8   : > { %1323 = shalt.err (!%p1320_p3)
}
 0x2b9   : > { %998 = dma.vmem_to_hbm [thread:$0]  (%p1539_p4), %s768_s8, 128, %s770_s16, %s750_s24  }
 0x2ba PF: > { %s1731_s19 = sld [smem:[#allocation23_spill]] }
 0x2bb   : > { %s1733_s2 = sld [smem:[#allocation25_spill]] }
 0x2c0   : > { %s796_s28 = sand.u32 1, %s1731_s19  }
 0x2c1   : > { %p1734_p12 = scmp.ge.s32.totalorder %s1733_s2, 2  ;;  %s797_s12 = scalar_lea.sflag [#allocation4], %s796_s28 }
 0x2c3   : > { %p1023_p7 = pnand %p1734_p12, %p1543_p6 }
 0x2c5   : > { %p1024_p9 = pneg %p1023_p7 }
 0x2c7   : > { %1361 = dma.done.wait (%p1024_p9), %s797_s12, 128  }
 0x2c8   : > { %1363 = vsyncadd (%p1024_p9), %s797_s12, 4294967168  ;;  %s807_s23 = scalar_lea.sflag [#allocation15], %s796_s28 }
 0x2c9   : > { %1365 = dma.done.wait (%p1024_p9), %s807_s23, 256  }
 0x2ca   : > { %1367 = vsyncadd (%p1024_p9), %s807_s23, 4294967040  ;;  %s1735_s20 = sld [smem:[#allocation26_spill]]  ;;  %s1738_s17 = smov %s1374_s18 }
 0x2cb   : > { %s1736_s29 = sld [smem:[#allocation24_spill]] }
 0x2cc   : > { %s1737_s19 = sld [smem:[#allocation27_spill]] }
 0x2d0   : > { %p33_p4 = scmp.ge.s32.totalorder %s1735_s20, 4  }
 0x2d1   : > { %s1739_s18 = smov %s1736_s29 }
 0x2d2   :  { %35 = sbr.rel (!%p33_p4) target bundleno = 16 (0x10), region = 151 }
 0x2d7   :  { %813 = vsyncpa [#allocation3], 1 }
 0x2d8   :  { %815 = vsyncpa [#allocation3 + $0x1], 1 }
 0x2d9   :  { %816 = vsyncpa [#allocation6], 1 }
 0x2da   :  { %818 = vsyncpa [#allocation6 + $0x1], 1 }
 0x2db   :  { %819 = vsyncpa [#allocation9], 1 }
 0x2dc   :  { %820 = vsyncpa [#allocation12], 1 }
 0x2dd   :  { %821 = vsyncpa [#allocation4], 1 }
 0x2de   :  { %823 = vsyncpa [#allocation4 + $0x1], 1 }
 0x2df   :  { %824 = vsyncpa [#allocation15], 1 }
 0x2e0   :  { %826 = vsyncpa [#allocation15 + $0x1], 1 }

</bundles_post_ra>
